<compile_context>
chip_gen: v7x
topology: tpu7x:2x2x1
jax: 0.10.0
libtpu: 0.0.40
codegen_flags: <defaults>
</compile_context>

<pallas_src>
import functools

import jax
import jax.numpy as jnp
from jax import lax
from jax.experimental import pallas as pl
from jax.experimental.pallas import tpu as pltpu


def _numerical_markowitz_kernel(rets_ref, gt_ref, gamma_ref, alpha_ref, out_ref, h_scr,
                                *, n_assets, max_weight, n_iter, n_bisect):
    f32 = jnp.float32
    neg_big = f32(-1e30)
    pos_big = f32(1e30)

    bs, _, ap = rets_ref.shape          # (Bs, 1, Ap)
    kdim = bs * ap

    # ---- load block; samples packed along sublanes: state is (Bs, Ap) ----
    rets = rets_ref[:, 0, :]                               # (Bs, Ap)  (ref-view squeeze)
    gt = gt_ref[...]                                       # (Bs, Ap, Ap) == covmat_sqrt^T
    gamma2 = gamma_ref[...] * gamma_ref[...]               # (Bs, 1, 1)
    alpha = jnp.abs(alpha_ref[...])                        # (Bs, 1, 1)

    # valid-asset lane mask, materialized once at full (Bs, Ap)
    mask2 = lax.broadcasted_iota(jnp.int32, (bs, ap), 1) < n_assets

    # ---- H = 2*(gamma^2 * G^T G + |alpha| * I), built once per block on the MXU ----
    # gt holds G^T, so G^T G = gt @ gt^T  (contract over the last dim of both operands).
    gtg = jnp.einsum('sik,sjk->sij', gt, gt, preferred_element_type=jnp.float32)
    row = lax.broadcasted_iota(jnp.int32, (ap, ap), 0)
    col = lax.broadcasted_iota(jnp.int32, (ap, ap), 1)
    eye = (row == col).astype(f32)                         # (Ap, Ap)
    h = 2.0 * gamma2 * gtg + (2.0 * alpha) * eye[None, :, :]    # (Bs, Ap, Ap)

    # Lipschitz bound for grad f:  ||H||_2 <= ||H||_inf  (max abs row sum), one pass.
    lips = jnp.max(jnp.sum(jnp.abs(h), axis=2), axis=1, keepdims=True) + f32(1e-6)
    inv_l = 1.0 / lips                                     # (Bs, 1)

    # Stack per-sample H's along sublanes: h_scr[s*Ap + i, j] = H[s, i, j].
    # Keeps the hot loop free of batched / 3-D dot operands.
    for s in range(bs):
        h_scr[s * ap:(s + 1) * ap, :] = h[s]

    # Block-diagonal selector: a single (Bs, Bs*Ap) @ (Bs*Ap, Ap) 2-D matmul then
    # computes all per-sample matvecs H_s @ y_s with the state kept sublane-packed.
    lane_blk = lax.broadcasted_iota(jnp.int32, (bs, kdim), 1) // ap
    row_id = lax.broadcasted_iota(jnp.int32, (bs, kdim), 0)
    blockmask = (lane_blk == row_id).astype(f32)           # (Bs, Bs*Ap)

    # ---- projection onto {w : sum w = 1, 0 <= w <= max_weight, padded lanes = 0} ----
    # Warm-started bisection: the root tau moves by at most ||v_new - v_old||_inf per
    # FISTA step, so a bracket of half-width (u_prev + d) around tau_prev always
    # contains it (intersected with the always-safe bracket).
    def project(v_raw, v_prev, tau_prev, u_prev):
        v = jnp.where(mask2, v_raw, neg_big)               # poison padded lanes once
        d = jnp.max(jnp.abs(v - v_prev), axis=1, keepdims=True)
        v_min = jnp.min(jnp.where(mask2, v, pos_big), axis=1, keepdims=True)
        v_max = jnp.max(v, axis=1, keepdims=True)
        r = u_prev + d + (f32(1e-6) + f32(1e-6) * jnp.abs(tau_prev))
        lo = jnp.maximum(tau_prev - r, v_min - max_weight)
        hi = jnp.minimum(tau_prev + r, v_max)
        hi = jnp.maximum(hi, lo)
        for _ in range(n_bisect):                          # short fixed trip -> unrolled
            tau = 0.5 * (lo + hi)
            ssum = jnp.sum(jnp.clip(v - tau, 0.0, max_weight), axis=1, keepdims=True)
            too_big = ssum > 1.0
            lo = jnp.where(too_big, tau, lo)
            hi = jnp.where(too_big, hi, tau)
        tau = 0.5 * (lo + hi)
        w = jnp.clip(v - tau, 0.0, max_weight)             # padded lanes -> exactly 0
        u = 0.5 * (hi - lo) + f32(1e-7)
        return w, v, tau, u

    # ---- projected FISTA ----
    w0 = jnp.where(mask2, f32(1.0 / n_assets), f32(0.0))   # feasible uniform start
    v0 = jnp.where(mask2, f32(0.0), neg_big)
    tau0 = jnp.zeros((bs, 1), f32)
    u0 = jnp.full((bs, 1), pos_big, f32)

    def fista_body(it, carry):
        w, y, v_prev, tau_prev, u_prev = carry
        if bs > 1:
            ybig = jnp.concatenate([y] * bs, axis=1) * blockmask   # (Bs, Bs*Ap)
        else:
            ybig = y
        hy = jnp.dot(ybig, h_scr[...], preferred_element_type=jnp.float32)  # (Bs, Ap)
        grad = hy - rets
        w_new, v_new, tau_new, u_new = project(y - grad * inv_l,
                                               v_prev, tau_prev, u_prev)
        itf = it.astype(f32)
        beta = itf / (itf + 3.0)                           # Nesterov momentum k/(k+3)
        y_new = w_new + beta * (w_new - w)
        return (w_new, y_new, v_new, tau_new, u_new)

    w_fin, _, _, _, _ = lax.fori_loop(0, n_iter, fista_body, (w0, w0, v0, tau0, u0))
    out_ref[:, 0, :] = w_fin.astype(out_ref.dtype)


def _choose_sample_block(n_samples, ap, requested):
    """Samples per grid step: pack into f32 sublanes (<=8), keep the double-buffered G
    block + stacked-H scratch within a conservative VMEM budget (fits v5e/v6e/v7x),
    avoid padding tiny batches, and keep >= 2 grid steps so v7x megacore can shard
    sample blocks across both TensorCores."""
    h_bytes = ap * ap * 4
    budget = 24 * 1024 * 1024
    bs = max(1, min(int(requested), 8, budget // (4 * h_bytes)))
    bs = min(bs, max(1, n_samples))
    if n_samples >= 2 and -(-n_samples // bs) < 2:
        bs = -(-n_samples // 2)
    return max(1, int(bs))


def numerical_markowitz(rets, covmat_sqrt, gamma_sqrt, alpha, *,
                        max_weight=1.0, n_iter=500, n_bisect=12,
                        sample_block=8, lane=128):
    """Forward pass of NumericalMarkowitz.

    rets: (S, A), covmat_sqrt: (S, A, A), gamma_sqrt: (S,), alpha: (S,)
    returns weights: (S, A)
    """
    rets = jnp.asarray(rets, jnp.float32)
    covmat_sqrt = jnp.asarray(covmat_sqrt, jnp.float32)
    gamma_sqrt = jnp.asarray(gamma_sqrt, jnp.float32)
    alpha = jnp.asarray(alpha, jnp.float32)

    S, A = rets.shape
    Ap = ((A + lane - 1) // lane) * lane                   # lane-dense asset axis
    Bs = _choose_sample_block(S, Ap, sample_block)
    Sp = pl.cdiv(S, Bs) * Bs

    rets_p = jnp.zeros((Sp, 1, Ap), jnp.float32).at[:S, 0, :A].set(rets)
    # Pass G^T so the in-kernel G^T G is a contract-over-last-dims batched matmul.
    gt_p = jnp.zeros((Sp, Ap, Ap), jnp.float32).at[:S, :A, :A].set(
        jnp.swapaxes(covmat_sqrt, 1, 2))
    gamma_p = jnp.zeros((Sp, 1, 1), jnp.float32).at[:S, 0, 0].set(gamma_sqrt)
    alpha_p = jnp.zeros((Sp, 1, 1), jnp.float32).at[:S, 0, 0].set(alpha)

    kernel = functools.partial(
        _numerical_markowitz_kernel,
        n_assets=A, max_weight=float(max_weight),
        n_iter=int(n_iter), n_bisect=int(n_bisect))

    h_bytes = Ap * Ap * 4
    vmem_limit = int(min(96 * 1024 * 1024,
                         max(32 * 1024 * 1024, 5 * Bs * h_bytes + (4 << 20))))

    out = pl.pallas_call(
        kernel,
        out_shape=jax.ShapeDtypeStruct((Sp, 1, Ap), jnp.float32),
        grid=(Sp // Bs,),
        in_specs=[
            pl.BlockSpec((Bs, 1, Ap), lambda i: (i, 0, 0)),
            pl.BlockSpec((Bs, Ap, Ap), lambda i: (i, 0, 0)),
            pl.BlockSpec((Bs, 1, 1), lambda i: (i, 0, 0)),
            pl.BlockSpec((Bs, 1, 1), lambda i: (i, 0, 0)),
        ],
        out_specs=pl.BlockSpec((Bs, 1, Ap), lambda i: (i, 0, 0)),
        scratch_shapes=[pltpu.VMEM((Bs * Ap, Ap), jnp.float32)],
        compiler_params=pltpu.CompilerParams(
            dimension_semantics=("parallel",),
            vmem_limit_bytes=vmem_limit),
    )(rets_p, gt_p, gamma_p, alpha_p)

    return out[:S, 0, :A]


if __name__ == "__main__":
    key = jax.random.PRNGKey(0)
    k1, k2, k3, k4 = jax.random.split(key, 4)

    S, A = 2, 8  # n_samples, n_assets
    covmat_sqrt = jax.random.normal(k1, (S, A, A), jnp.float32) / jnp.sqrt(A)
    rets = 0.05 * jax.random.normal(k2, (S, A), jnp.float32)
    gamma_sqrt = 1.0 + 0.1 * jax.random.normal(k3, (S,), jnp.float32)
    alpha = 0.05 * jnp.abs(jax.random.normal(k4, (S,), jnp.float32)) + 0.01

    w = numerical_markowitz(rets, covmat_sqrt, gamma_sqrt, alpha)
    w = jax.block_until_ready(w)

    assert w.shape == (S, A)
    # Constraints: sum(w) == 1, 0 <= w <= max_weight.
    assert jnp.allclose(jnp.sum(w, axis=-1), 1.0, atol=1e-4), w
    assert bool(jnp.all(w >= -1e-4)) and bool(jnp.all(w <= 1.0 + 1e-4)), w

    # Sanity: the solver's objective should be at least as good as uniform weights.
    def objective(ww):
        g_scaled = gamma_sqrt[:, None, None] * covmat_sqrt
        gw = jnp.einsum('sij,sj->si', g_scaled, ww)
        return (jnp.sum(rets * ww, -1) - jnp.sum(gw * gw, -1)
                - jnp.abs(alpha) * jnp.sum(ww * ww, -1))

    uniform = jnp.full((S, A), 1.0 / A, jnp.float32)
    assert bool(jnp.all(objective(w) >= objective(uniform) - 1e-5)), (
        objective(w), objective(uniform))

    print("KERNEL_OK")
</pallas_src>

<mosaic_0001>
module attributes {stable_mosaic.version = 11 : i64} {
  func.func @_numerical_markowitz_kernel(%arg0: i32, %arg1: memref<1x1x128xf32, #tpu.memory_space<vmem>>, %arg2: memref<1x128x128xf32, #tpu.memory_space<vmem>>, %arg3: memref<1x1x1xf32, #tpu.memory_space<vmem>>, %arg4: memref<1x1x1xf32, #tpu.memory_space<vmem>>, %arg5: memref<1x1x128xf32, #tpu.memory_space<vmem>>, %arg6: memref<128x128xf32, #tpu.memory_space<vmem>>) attributes {dimension_semantics = [#tpu.dimension_semantics<parallel>], iteration_bounds = array<i64: 2>, scalar_prefetch = 0 : i64, scratch_operands = 1 : i64, tpu.core_type = #tpu.core_type<tc>, window_params = [{transform_indices = @transform_0, window_bounds = array<i64: 1, 1, 128>}, {transform_indices = @transform_1, window_bounds = array<i64: 1, 128, 128>}, {transform_indices = @transform_2, window_bounds = array<i64: 1, 1, 1>}, {transform_indices = @transform_3, window_bounds = array<i64: 1, 1, 1>}, {transform_indices = @transform_4, window_bounds = array<i64: 1, 1, 128>}]} {
    %c0 = arith.constant 0 : index
    %c0_0 = arith.constant 0 : index
    %c0_1 = arith.constant 0 : index
    %0 = vector.load %arg1[%c0, %c0_0, %c0_1] : memref<1x1x128xf32, #tpu.memory_space<vmem>>, vector<1x1x128xf32>
    %1 = vector.shape_cast %0 : vector<1x1x128xf32> to vector<1x128xf32>
    %c0_2 = arith.constant 0 : index
    %c0_3 = arith.constant 0 : index
    %c0_4 = arith.constant 0 : index
    %2 = vector.load %arg2[%c0_2, %c0_3, %c0_4] : memref<1x128x128xf32, #tpu.memory_space<vmem>>, vector<1x128x128xf32>
    %c0_5 = arith.constant 0 : index
    %c0_6 = arith.constant 0 : index
    %c0_7 = arith.constant 0 : index
    %3 = vector.load %arg3[%c0_5, %c0_6, %c0_7] : memref<1x1x1xf32, #tpu.memory_space<vmem>>, vector<1x1x1xf32>
    %c0_8 = arith.constant 0 : index
    %c0_9 = arith.constant 0 : index
    %c0_10 = arith.constant 0 : index
    %4 = vector.load %arg3[%c0_8, %c0_9, %c0_10] : memref<1x1x1xf32, #tpu.memory_space<vmem>>, vector<1x1x1xf32>
    %5 = arith.mulf %3, %4 : vector<1x1x1xf32>
    %c0_11 = arith.constant 0 : index
    %c0_12 = arith.constant 0 : index
    %c0_13 = arith.constant 0 : index
    %6 = vector.load %arg4[%c0_11, %c0_12, %c0_13] : memref<1x1x1xf32, #tpu.memory_space<vmem>>, vector<1x1x1xf32>
    %7 = math.absf %6 : vector<1x1x1xf32>
    %8 = tpu.iota {dimensions = array<i32: 1>} : vector<1x128xi32>
    %c8_i32 = arith.constant 8 : i32
    %9 = vector.broadcast %c8_i32 : i32 to vector<1x128xi32>
    %10 = arith.cmpi slt, %8, %9 : vector<1x128xi32>
    "tpu.trace_start"() <{level = 10 : i32, message = "sik,sjk->sij"}> : () -> ()
    %cst = arith.constant dense<0.000000e+00> : vector<1x128x128xf32>
    %11 = tpu.matmul %2, %2, %cst {dimension_numbers = #tpu.dot_dimension_numbers<[2], [2], [1], [1], [0, 0, 0, 1, 1, 1], [0], [0]>} : vector<1x128x128xf32>, vector<1x128x128xf32>, vector<1x128x128xf32> -> vector<1x128x128xf32>
    "tpu.trace_stop"() : () -> ()
    %12 = tpu.iota {dimensions = array<i32: 0>} : vector<128x128xi32>
    %13 = tpu.iota {dimensions = array<i32: 1>} : vector<128x128xi32>
    %14 = arith.cmpi eq, %12, %13 : vector<128x128xi32>
    %15 = arith.extui %14 : vector<128x128xi1> to vector<128x128xi32>
    %16 = arith.sitofp %15 : vector<128x128xi32> to vector<128x128xf32>
    %cst_14 = arith.constant 2.000000e+00 : f32
    %17 = vector.broadcast %cst_14 : f32 to vector<1x1x1xf32>
    %18 = arith.mulf %17, %5 : vector<1x1x1xf32>
    %19 = vector.broadcast %18 : vector<1x1x1xf32> to vector<1x128x128xf32>
    %20 = arith.mulf %19, %11 : vector<1x128x128xf32>
    %cst_15 = arith.constant 2.000000e+00 : f32
    %21 = vector.broadcast %cst_15 : f32 to vector<1x1x1xf32>
    %22 = arith.mulf %21, %7 : vector<1x1x1xf32>
    %23 = vector.shape_cast %16 : vector<128x128xf32> to vector<1x128x128xf32>
    %24 = vector.broadcast %22 : vector<1x1x1xf32> to vector<1x128x128xf32>
    %25 = arith.mulf %24, %23 : vector<1x128x128xf32>
    %26 = arith.addf %20, %25 : vector<1x128x128xf32>
    %27 = math.absf %26 : vector<1x128x128xf32>
    %cst_16 = arith.constant dense<0.000000e+00> : vector<1x128xf32>
    %28 = vector.multi_reduction <add>, %27, %cst_16 [2] : vector<1x128x128xf32> to vector<1x128xf32>
    %cst_17 = arith.constant dense<0xFF800000> : vector<1xf32>
    %29 = vector.multi_reduction <maximumf>, %28, %cst_17 [1] : vector<1x128xf32> to vector<1xf32>
    %30 = vector.shape_cast %29 : vector<1xf32> to vector<1x1xf32>
    %cst_18 = arith.constant 9.99999997E-7 : f32
    %31 = vector.broadcast %cst_18 : f32 to vector<1x1xf32>
    %32 = arith.addf %30, %31 : vector<1x1xf32>
    %cst_19 = arith.constant 1.000000e+00 : f32
    %33 = vector.broadcast %cst_19 : f32 to vector<1x1xf32>
    %34 = arith.divf %33, %32 : vector<1x1xf32>
    %35 = vector.shape_cast %26 : vector<1x128x128xf32> to vector<128x128xf32>
    %c0_20 = arith.constant 0 : index
    %c0_21 = arith.constant 0 : index
    %36 = vector.load %arg6[%c0_20, %c0_21] : memref<128x128xf32, #tpu.memory_space<vmem>>, vector<128x128xf32>
    tpu.vector_store %arg6[%c0_20, %c0_21], %35 {strides = array<i32>} : memref<128x128xf32, #tpu.memory_space<vmem>>, vector<128x128xf32>,
    %cst_22 = arith.constant 1.250000e-01 : f32
    %cst_23 = arith.constant 0.000000e+00 : f32
    %37 = vector.broadcast %cst_22 : f32 to vector<1x128xf32>
    %38 = vector.broadcast %cst_23 : f32 to vector<1x128xf32>
    %39 = arith.select %10, %37, %38 : vector<1x128xi1>, vector<1x128xf32>
    %cst_24 = arith.constant 0.000000e+00 : f32
    %cst_25 = arith.constant -1.000000e+30 : f32
    %40 = vector.broadcast %cst_24 : f32 to vector<1x128xf32>
    %41 = vector.broadcast %cst_25 : f32 to vector<1x128xf32>
    %42 = arith.select %10, %40, %41 : vector<1x128xi1>, vector<1x128xf32>
    %cst_26 = arith.constant 0.000000e+00 : f32
    %43 = vector.broadcast %cst_26 : f32 to vector<1x1xf32>
    %cst_27 = arith.constant 1.000000e+30 : f32
    %44 = vector.broadcast %cst_27 : f32 to vector<1x1xf32>
    %cst_28 = arith.constant -1.000000e+30 : f32
    %cst_29 = arith.constant 1.000000e+30 : f32
    %c0_i32 = arith.constant 0 : i32
    %c500_i32 = arith.constant 500 : i32
    %45 = arith.addi %c0_i32, %c500_i32 : i32
    %c1_i32 = arith.constant 1 : i32
    %46:5 = scf.for %arg7 = %c0_i32 to %45 step %c1_i32 iter_args(%arg8 = %39, %arg9 = %39, %arg10 = %42, %arg11 = %43, %arg12 = %44) -> (vector<1x128xf32>, vector<1x128xf32>, vector<1x128xf32>, vector<1x1xf32>, vector<1x1xf32>)  : i32 {
      %c0_34 = arith.constant 0 : index
      %c0_35 = arith.constant 0 : index
      %50 = vector.load %arg6[%c0_34, %c0_35] : memref<128x128xf32, #tpu.memory_space<vmem>>, vector<128x128xf32>
      %cst_36 = arith.constant dense<0.000000e+00> : vector<1x128xf32>
      %51 = tpu.matmul %arg9, %50, %cst_36 {dimension_numbers = #tpu.dot_dimension_numbers<[1], [0], [0], [1], [0, 0, 1, 1], [], []>} : vector<1x128xf32>, vector<128x128xf32>, vector<1x128xf32> -> vector<1x128xf32>
      %52 = arith.subf %51, %1 : vector<1x128xf32>
      %53 = vector.broadcast %34 : vector<1x1xf32> to vector<1x128xf32>
      %54 = arith.mulf %52, %53 : vector<1x128xf32>
      %55 = arith.subf %arg9, %54 : vector<1x128xf32>
      %56 = vector.broadcast %cst_28 : f32 to vector<1x128xf32>
      %57 = arith.select %10, %55, %56 : vector<1x128xi1>, vector<1x128xf32>
      %58 = arith.subf %57, %arg10 : vector<1x128xf32>
      %59 = math.absf %58 : vector<1x128xf32>
      %cst_37 = arith.constant dense<0xFF800000> : vector<1xf32>
      %60 = vector.multi_reduction <maximumf>, %59, %cst_37 [1] : vector<1x128xf32> to vector<1xf32>
      %61 = vector.shape_cast %60 : vector<1xf32> to vector<1x1xf32>
      %62 = vector.broadcast %cst_29 : f32 to vector<1x128xf32>
      %63 = arith.select %10, %57, %62 : vector<1x128xi1>, vector<1x128xf32>
      %cst_38 = arith.constant dense<0x7F800000> : vector<1xf32>
      %64 = vector.multi_reduction <minimumf>, %63, %cst_38 [1] : vector<1x128xf32> to vector<1xf32>
      %65 = vector.shape_cast %64 : vector<1xf32> to vector<1x1xf32>
      %cst_39 = arith.constant dense<0xFF800000> : vector<1xf32>
      %66 = vector.multi_reduction <maximumf>, %57, %cst_39 [1] : vector<1x128xf32> to vector<1xf32>
      %67 = vector.shape_cast %66 : vector<1xf32> to vector<1x1xf32>
      %68 = arith.addf %arg12, %61 : vector<1x1xf32>
      %69 = math.absf %arg11 : vector<1x1xf32>
      %cst_40 = arith.constant 9.99999997E-7 : f32
      %70 = vector.broadcast %cst_40 : f32 to vector<1x1xf32>
      %71 = arith.mulf %70, %69 : vector<1x1xf32>
      %cst_41 = arith.constant 9.99999997E-7 : f32
      %72 = vector.broadcast %cst_41 : f32 to vector<1x1xf32>
      %73 = arith.addf %72, %71 : vector<1x1xf32>
      %74 = arith.addf %68, %73 : vector<1x1xf32>
      %75 = arith.subf %arg11, %74 : vector<1x1xf32>
      %cst_42 = arith.constant 1.000000e+00 : f32
      %76 = vector.broadcast %cst_42 : f32 to vector<1x1xf32>
      %77 = arith.subf %65, %76 : vector<1x1xf32>
      %78 = arith.maximumf %75, %77 : vector<1x1xf32>
      %79 = arith.addf %arg11, %74 : vector<1x1xf32>
      %80 = arith.minimumf %79, %67 : vector<1x1xf32>
      %81 = arith.maximumf %80, %78 : vector<1x1xf32>
      %82 = arith.addf %78, %81 : vector<1x1xf32>
      %cst_43 = arith.constant 5.000000e-01 : f32
      %83 = vector.broadcast %cst_43 : f32 to vector<1x1xf32>
      %84 = arith.mulf %83, %82 : vector<1x1xf32>
      %85 = vector.broadcast %84 : vector<1x1xf32> to vector<1x128xf32>
      %86 = arith.subf %57, %85 : vector<1x128xf32>
      %cst_44 = arith.constant 0.000000e+00 : f32
      %cst_45 = arith.constant 1.000000e+00 : f32
      %87 = vector.broadcast %cst_44 : f32 to vector<1x128xf32>
      %88 = arith.maximumf %87, %86 : vector<1x128xf32>
      %89 = vector.broadcast %cst_45 : f32 to vector<1x128xf32>
      %90 = arith.minimumf %89, %88 : vector<1x128xf32>
      %cst_46 = arith.constant dense<0.000000e+00> : vector<1xf32>
      %91 = vector.multi_reduction <add>, %90, %cst_46 [1] : vector<1x128xf32> to vector<1xf32>
      %92 = vector.shape_cast %91 : vector<1xf32> to vector<1x1xf32>
      %cst_47 = arith.constant 1.000000e+00 : f32
      %93 = vector.broadcast %cst_47 : f32 to vector<1x1xf32>
      %94 = arith.cmpf ogt, %92, %93 : vector<1x1xf32>
      %95 = arith.select %94, %84, %78 : vector<1x1xi1>, vector<1x1xf32>
      %96 = arith.select %94, %81, %84 : vector<1x1xi1>, vector<1x1xf32>
      %97 = arith.addf %95, %96 : vector<1x1xf32>
      %cst_48 = arith.constant 5.000000e-01 : f32
      %98 = vector.broadcast %cst_48 : f32 to vector<1x1xf32>
      %99 = arith.mulf %98, %97 : vector<1x1xf32>
      %100 = vector.broadcast %99 : vector<1x1xf32> to vector<1x128xf32>
      %101 = arith.subf %57, %100 : vector<1x128xf32>
      %cst_49 = arith.constant 0.000000e+00 : f32
      %cst_50 = arith.constant 1.000000e+00 : f32
      %102 = vector.broadcast %cst_49 : f32 to vector<1x128xf32>
      %103 = arith.maximumf %102, %101 : vector<1x128xf32>
      %104 = vector.broadcast %cst_50 : f32 to vector<1x128xf32>
      %105 = arith.minimumf %104, %103 : vector<1x128xf32>
      %cst_51 = arith.constant dense<0.000000e+00> : vector<1xf32>
      %106 = vector.multi_reduction <add>, %105, %cst_51 [1] : vector<1x128xf32> to vector<1xf32>
      %107 = vector.shape_cast %106 : vector<1xf32> to vector<1x1xf32>
      %cst_52 = arith.constant 1.000000e+00 : f32
      %108 = vector.broadcast %cst_52 : f32 to vector<1x1xf32>
      %109 = arith.cmpf ogt, %107, %108 : vector<1x1xf32>
      %110 = arith.select %109, %99, %95 : vector<1x1xi1>, vector<1x1xf32>
      %111 = arith.select %109, %96, %99 : vector<1x1xi1>, vector<1x1xf32>
      %112 = arith.addf %110, %111 : vector<1x1xf32>
      %cst_53 = arith.constant 5.000000e-01 : f32
      %113 = vector.broadcast %cst_53 : f32 to vector<1x1xf32>
      %114 = arith.mulf %113, %112 : vector<1x1xf32>
      %115 = vector.broadcast %114 : vector<1x1xf32> to vector<1x128xf32>
      %116 = arith.subf %57, %115 : vector<1x128xf32>
      %cst_54 = arith.constant 0.000000e+00 : f32
      %cst_55 = arith.constant 1.000000e+00 : f32
      %117 = vector.broadcast %cst_54 : f32 to vector<1x128xf32>
      %118 = arith.maximumf %117, %116 : vector<1x128xf32>
      %119 = vector.broadcast %cst_55 : f32 to vector<1x128xf32>
      %120 = arith.minimumf %119, %118 : vector<1x128xf32>
      %cst_56 = arith.constant dense<0.000000e+00> : vector<1xf32>
      %121 = vector.multi_reduction <add>, %120, %cst_56 [1] : vector<1x128xf32> to vector<1xf32>
      %122 = vector.shape_cast %121 : vector<1xf32> to vector<1x1xf32>
      %cst_57 = arith.constant 1.000000e+00 : f32
      %123 = vector.broadcast %cst_57 : f32 to vector<1x1xf32>
      %124 = arith.cmpf ogt, %122, %123 : vector<1x1xf32>
      %125 = arith.select %124, %114, %110 : vector<1x1xi1>, vector<1x1xf32>
      %126 = arith.select %124, %111, %114 : vector<1x1xi1>, vector<1x1xf32>
      %127 = arith.addf %125, %126 : vector<1x1xf32>
      %cst_58 = arith.constant 5.000000e-01 : f32
      %128 = vector.broadcast %cst_58 : f32 to vector<1x1xf32>
      %129 = arith.mulf %128, %127 : vector<1x1xf32>
      %130 = vector.broadcast %129 : vector<1x1xf32> to vector<1x128xf32>
      %131 = arith.subf %57, %130 : vector<1x128xf32>
      %cst_59 = arith.constant 0.000000e+00 : f32
      %cst_60 = arith.constant 1.000000e+00 : f32
      %132 = vector.broadcast %cst_59 : f32 to vector<1x128xf32>
      %133 = arith.maximumf %132, %131 : vector<1x128xf32>
      %134 = vector.broadcast %cst_60 : f32 to vector<1x128xf32>
      %135 = arith.minimumf %134, %133 : vector<1x128xf32>
      %cst_61 = arith.constant dense<0.000000e+00> : vector<1xf32>
      %136 = vector.multi_reduction <add>, %135, %cst_61 [1] : vector<1x128xf32> to vector<1xf32>
      %137 = vector.shape_cast %136 : vector<1xf32> to vector<1x1xf32>
      %cst_62 = arith.constant 1.000000e+00 : f32
      %138 = vector.broadcast %cst_62 : f32 to vector<1x1xf32>
      %139 = arith.cmpf ogt, %137, %138 : vector<1x1xf32>
      %140 = arith.select %139, %129, %125 : vector<1x1xi1>, vector<1x1xf32>
      %141 = arith.select %139, %126, %129 : vector<1x1xi1>, vector<1x1xf32>
      %142 = arith.addf %140, %141 : vector<1x1xf32>
      %cst_63 = arith.constant 5.000000e-01 : f32
      %143 = vector.broadcast %cst_63 : f32 to vector<1x1xf32>
      %144 = arith.mulf %143, %142 : vector<1x1xf32>
      %145 = vector.broadcast %144 : vector<1x1xf32> to vector<1x128xf32>
      %146 = arith.subf %57, %145 : vector<1x128xf32>
      %cst_64 = arith.constant 0.000000e+00 : f32
      %cst_65 = arith.constant 1.000000e+00 : f32
      %147 = vector.broadcast %cst_64 : f32 to vector<1x128xf32>
      %148 = arith.maximumf %147, %146 : vector<1x128xf32>
      %149 = vector.broadcast %cst_65 : f32 to vector<1x128xf32>
      %150 = arith.minimumf %149, %148 : vector<1x128xf32>
      %cst_66 = arith.constant dense<0.000000e+00> : vector<1xf32>
      %151 = vector.multi_reduction <add>, %150, %cst_66 [1] : vector<1x128xf32> to vector<1xf32>
      %152 = vector.shape_cast %151 : vector<1xf32> to vector<1x1xf32>
      %cst_67 = arith.constant 1.000000e+00 : f32
      %153 = vector.broadcast %cst_67 : f32 to vector<1x1xf32>
      %154 = arith.cmpf ogt, %152, %153 : vector<1x1xf32>
      %155 = arith.select %154, %144, %140 : vector<1x1xi1>, vector<1x1xf32>
      %156 = arith.select %154, %141, %144 : vector<1x1xi1>, vector<1x1xf32>
      %157 = arith.addf %155, %156 : vector<1x1xf32>
      %cst_68 = arith.constant 5.000000e-01 : f32
      %158 = vector.broadcast %cst_68 : f32 to vector<1x1xf32>
      %159 = arith.mulf %158, %157 : vector<1x1xf32>
      %160 = vector.broadcast %159 : vector<1x1xf32> to vector<1x128xf32>
      %161 = arith.subf %57, %160 : vector<1x128xf32>
      %cst_69 = arith.constant 0.000000e+00 : f32
      %cst_70 = arith.constant 1.000000e+00 : f32
      %162 = vector.broadcast %cst_69 : f32 to vector<1x128xf32>
      %163 = arith.maximumf %162, %161 : vector<1x128xf32>
      %164 = vector.broadcast %cst_70 : f32 to vector<1x128xf32>
      %165 = arith.minimumf %164, %163 : vector<1x128xf32>
      %cst_71 = arith.constant dense<0.000000e+00> : vector<1xf32>
      %166 = vector.multi_reduction <add>, %165, %cst_71 [1] : vector<1x128xf32> to vector<1xf32>
      %167 = vector.shape_cast %166 : vector<1xf32> to vector<1x1xf32>
      %cst_72 = arith.constant 1.000000e+00 : f32
      %168 = vector.broadcast %cst_72 : f32 to vector<1x1xf32>
      %169 = arith.cmpf ogt, %167, %168 : vector<1x1xf32>
      %170 = arith.select %169, %159, %155 : vector<1x1xi1>, vector<1x1xf32>
      %171 = arith.select %169, %156, %159 : vector<1x1xi1>, vector<1x1xf32>
      %172 = arith.addf %170, %171 : vector<1x1xf32>
      %cst_73 = arith.constant 5.000000e-01 : f32
      %173 = vector.broadcast %cst_73 : f32 to vector<1x1xf32>
      %174 = arith.mulf %173, %172 : vector<1x1xf32>
      %175 = vector.broadcast %174 : vector<1x1xf32> to vector<1x128xf32>
      %176 = arith.subf %57, %175 : vector<1x128xf32>
      %cst_74 = arith.constant 0.000000e+00 : f32
      %cst_75 = arith.constant 1.000000e+00 : f32
      %177 = vector.broadcast %cst_74 : f32 to vector<1x128xf32>
      %178 = arith.maximumf %177, %176 : vector<1x128xf32>
      %179 = vector.broadcast %cst_75 : f32 to vector<1x128xf32>
      %180 = arith.minimumf %179, %178 : vector<1x128xf32>
      %cst_76 = arith.constant dense<0.000000e+00> : vector<1xf32>
      %181 = vector.multi_reduction <add>, %180, %cst_76 [1] : vector<1x128xf32> to vector<1xf32>
      %182 = vector.shape_cast %181 : vector<1xf32> to vector<1x1xf32>
      %cst_77 = arith.constant 1.000000e+00 : f32
      %183 = vector.broadcast %cst_77 : f32 to vector<1x1xf32>
      %184 = arith.cmpf ogt, %182, %183 : vector<1x1xf32>
      %185 = arith.select %184, %174, %170 : vector<1x1xi1>, vector<1x1xf32>
      %186 = arith.select %184, %171, %174 : vector<1x1xi1>, vector<1x1xf32>
      %187 = arith.addf %185, %186 : vector<1x1xf32>
      %cst_78 = arith.constant 5.000000e-01 : f32
      %188 = vector.broadcast %cst_78 : f32 to vector<1x1xf32>
      %189 = arith.mulf %188, %187 : vector<1x1xf32>
      %190 = vector.broadcast %189 : vector<1x1xf32> to vector<1x128xf32>
      %191 = arith.subf %57, %190 : vector<1x128xf32>
      %cst_79 = arith.constant 0.000000e+00 : f32
      %cst_80 = arith.constant 1.000000e+00 : f32
      %192 = vector.broadcast %cst_79 : f32 to vector<1x128xf32>
      %193 = arith.maximumf %192, %191 : vector<1x128xf32>
      %194 = vector.broadcast %cst_80 : f32 to vector<1x128xf32>
      %195 = arith.minimumf %194, %193 : vector<1x128xf32>
      %cst_81 = arith.constant dense<0.000000e+00> : vector<1xf32>
      %196 = vector.multi_reduction <add>, %195, %cst_81 [1] : vector<1x128xf32> to vector<1xf32>
      %197 = vector.shape_cast %196 : vector<1xf32> to vector<1x1xf32>
      %cst_82 = arith.constant 1.000000e+00 : f32
      %198 = vector.broadcast %cst_82 : f32 to vector<1x1xf32>
      %199 = arith.cmpf ogt, %197, %198 : vector<1x1xf32>
      %200 = arith.select %199, %189, %185 : vector<1x1xi1>, vector<1x1xf32>
      %201 = arith.select %199, %186, %189 : vector<1x1xi1>, vector<1x1xf32>
      %202 = arith.addf %200, %201 : vector<1x1xf32>
      %cst_83 = arith.constant 5.000000e-01 : f32
      %203 = vector.broadcast %cst_83 : f32 to vector<1x1xf32>
      %204 = arith.mulf %203, %202 : vector<1x1xf32>
      %205 = vector.broadcast %204 : vector<1x1xf32> to vector<1x128xf32>
      %206 = arith.subf %57, %205 : vector<1x128xf32>
      %cst_84 = arith.constant 0.000000e+00 : f32
      %cst_85 = arith.constant 1.000000e+00 : f32
      %207 = vector.broadcast %cst_84 : f32 to vector<1x128xf32>
      %208 = arith.maximumf %207, %206 : vector<1x128xf32>
      %209 = vector.broadcast %cst_85 : f32 to vector<1x128xf32>
      %210 = arith.minimumf %209, %208 : vector<1x128xf32>
      %cst_86 = arith.constant dense<0.000000e+00> : vector<1xf32>
      %211 = vector.multi_reduction <add>, %210, %cst_86 [1] : vector<1x128xf32> to vector<1xf32>
      %212 = vector.shape_cast %211 : vector<1xf32> to vector<1x1xf32>
      %cst_87 = arith.constant 1.000000e+00 : f32
      %213 = vector.broadcast %cst_87 : f32 to vector<1x1xf32>
      %214 = arith.cmpf ogt, %212, %213 : vector<1x1xf32>
      %215 = arith.select %214, %204, %200 : vector<1x1xi1>, vector<1x1xf32>
      %216 = arith.select %214, %201, %204 : vector<1x1xi1>, vector<1x1xf32>
      %217 = arith.addf %215, %216 : vector<1x1xf32>
      %cst_88 = arith.constant 5.000000e-01 : f32
      %218 = vector.broadcast %cst_88 : f32 to vector<1x1xf32>
      %219 = arith.mulf %218, %217 : vector<1x1xf32>
      %220 = vector.broadcast %219 : vector<1x1xf32> to vector<1x128xf32>
      %221 = arith.subf %57, %220 : vector<1x128xf32>
      %cst_89 = arith.constant 0.000000e+00 : f32
      %cst_90 = arith.constant 1.000000e+00 : f32
      %222 = vector.broadcast %cst_89 : f32 to vector<1x128xf32>
      %223 = arith.maximumf %222, %221 : vector<1x128xf32>
      %224 = vector.broadcast %cst_90 : f32 to vector<1x128xf32>
      %225 = arith.minimumf %224, %223 : vector<1x128xf32>
      %cst_91 = arith.constant dense<0.000000e+00> : vector<1xf32>
      %226 = vector.multi_reduction <add>, %225, %cst_91 [1] : vector<1x128xf32> to vector<1xf32>
      %227 = vector.shape_cast %226 : vector<1xf32> to vector<1x1xf32>
      %cst_92 = arith.constant 1.000000e+00 : f32
      %228 = vector.broadcast %cst_92 : f32 to vector<1x1xf32>
      %229 = arith.cmpf ogt, %227, %228 : vector<1x1xf32>
      %230 = arith.select %229, %219, %215 : vector<1x1xi1>, vector<1x1xf32>
      %231 = arith.select %229, %216, %219 : vector<1x1xi1>, vector<1x1xf32>
      %232 = arith.addf %230, %231 : vector<1x1xf32>
      %cst_93 = arith.constant 5.000000e-01 : f32
      %233 = vector.broadcast %cst_93 : f32 to vector<1x1xf32>
      %234 = arith.mulf %233, %232 : vector<1x1xf32>
      %235 = vector.broadcast %234 : vector<1x1xf32> to vector<1x128xf32>
      %236 = arith.subf %57, %235 : vector<1x128xf32>
      %cst_94 = arith.constant 0.000000e+00 : f32
      %cst_95 = arith.constant 1.000000e+00 : f32
      %237 = vector.broadcast %cst_94 : f32 to vector<1x128xf32>
      %238 = arith.maximumf %237, %236 : vector<1x128xf32>
      %239 = vector.broadcast %cst_95 : f32 to vector<1x128xf32>
      %240 = arith.minimumf %239, %238 : vector<1x128xf32>
      %cst_96 = arith.constant dense<0.000000e+00> : vector<1xf32>
      %241 = vector.multi_reduction <add>, %240, %cst_96 [1] : vector<1x128xf32> to vector<1xf32>
      %242 = vector.shape_cast %241 : vector<1xf32> to vector<1x1xf32>
      %cst_97 = arith.constant 1.000000e+00 : f32
      %243 = vector.broadcast %cst_97 : f32 to vector<1x1xf32>
      %244 = arith.cmpf ogt, %242, %243 : vector<1x1xf32>
      %245 = arith.select %244, %234, %230 : vector<1x1xi1>, vector<1x1xf32>
      %246 = arith.select %244, %231, %234 : vector<1x1xi1>, vector<1x1xf32>
      %247 = arith.addf %245, %246 : vector<1x1xf32>
      %cst_98 = arith.constant 5.000000e-01 : f32
      %248 = vector.broadcast %cst_98 : f32 to vector<1x1xf32>
      %249 = arith.mulf %248, %247 : vector<1x1xf32>
      %250 = vector.broadcast %249 : vector<1x1xf32> to vector<1x128xf32>
      %251 = arith.subf %57, %250 : vector<1x128xf32>
      %cst_99 = arith.constant 0.000000e+00 : f32
      %cst_100 = arith.constant 1.000000e+00 : f32
      %252 = vector.broadcast %cst_99 : f32 to vector<1x128xf32>
      %253 = arith.maximumf %252, %251 : vector<1x128xf32>
      %254 = vector.broadcast %cst_100 : f32 to vector<1x128xf32>
      %255 = arith.minimumf %254, %253 : vector<1x128xf32>
      %cst_101 = arith.constant dense<0.000000e+00> : vector<1xf32>
      %256 = vector.multi_reduction <add>, %255, %cst_101 [1] : vector<1x128xf32> to vector<1xf32>
      %257 = vector.shape_cast %256 : vector<1xf32> to vector<1x1xf32>
      %cst_102 = arith.constant 1.000000e+00 : f32
      %258 = vector.broadcast %cst_102 : f32 to vector<1x1xf32>
      %259 = arith.cmpf ogt, %257, %258 : vector<1x1xf32>
      %260 = arith.select %259, %249, %245 : vector<1x1xi1>, vector<1x1xf32>
      %261 = arith.select %259, %246, %249 : vector<1x1xi1>, vector<1x1xf32>
      %262 = arith.addf %260, %261 : vector<1x1xf32>
      %cst_103 = arith.constant 5.000000e-01 : f32
      %263 = vector.broadcast %cst_103 : f32 to vector<1x1xf32>
      %264 = arith.mulf %263, %262 : vector<1x1xf32>
      %265 = vector.broadcast %264 : vector<1x1xf32> to vector<1x128xf32>
      %266 = arith.subf %57, %265 : vector<1x128xf32>
      %cst_104 = arith.constant 0.000000e+00 : f32
      %cst_105 = arith.constant 1.000000e+00 : f32
      %267 = vector.broadcast %cst_104 : f32 to vector<1x128xf32>
      %268 = arith.maximumf %267, %266 : vector<1x128xf32>
      %269 = vector.broadcast %cst_105 : f32 to vector<1x128xf32>
      %270 = arith.minimumf %269, %268 : vector<1x128xf32>
      %271 = arith.subf %261, %260 : vector<1x1xf32>
      %cst_106 = arith.constant 5.000000e-01 : f32
      %272 = vector.broadcast %cst_106 : f32 to vector<1x1xf32>
      %273 = arith.mulf %272, %271 : vector<1x1xf32>
      %cst_107 = arith.constant 1.000000e-07 : f32
      %274 = vector.broadcast %cst_107 : f32 to vector<1x1xf32>
      %275 = arith.addf %273, %274 : vector<1x1xf32>
      %276 = arith.sitofp %arg7 : i32 to f32
      %cst_108 = arith.constant 3.000000e+00 : f32
      %277 = arith.addf %276, %cst_108 : f32
      %278 = arith.divf %276, %277 : f32
      %279 = arith.subf %270, %arg8 : vector<1x128xf32>
      %280 = vector.broadcast %278 : f32 to vector<1x128xf32>
      %281 = arith.mulf %280, %279 : vector<1x128xf32>
      %282 = arith.addf %270, %281 : vector<1x128xf32>
      scf.yield %270, %282, %57, %264, %275 : vector<1x128xf32>, vector<1x128xf32>, vector<1x128xf32>, vector<1x1xf32>, vector<1x1xf32>
    }
    %c500_i32_30 = arith.constant 500 : i32
    %c0_31 = arith.constant 0 : index
    %c0_32 = arith.constant 0 : index
    %c0_33 = arith.constant 0 : index
    %47 = vector.load %arg5[%c0_31, %c0_32, %c0_33] : memref<1x1x128xf32, #tpu.memory_space<vmem>>, vector<1x1x128xf32>
    %48 = vector.shape_cast %47 : vector<1x1x128xf32> to vector<1x128xf32>
    %49 = vector.shape_cast %46#0 : vector<1x128xf32> to vector<1x1x128xf32>
    tpu.vector_store %arg5[%c0_31, %c0_32, %c0_33], %49 {strides = array<i32>} : memref<1x1x128xf32, #tpu.memory_space<vmem>>, vector<1x1x128xf32>,
    return
  }
  func.func @transform_0(%arg0: i32) -> (i32, i32, i32) {
    %c0_i32 = arith.constant 0 : i32
    %c0_i32_0 = arith.constant 0 : i32
    %c0_i32_1 = arith.constant 0 : i32
    return %arg0, %c0_i32, %c0_i32_0 : i32, i32, i32
  }
  func.func @transform_1(%arg0: i32) -> (i32, i32, i32) {
    %c0_i32 = arith.constant 0 : i32
    %c0_i32_0 = arith.constant 0 : i32
    %c0_i32_1 = arith.constant 0 : i32
    return %arg0, %c0_i32, %c0_i32_0 : i32, i32, i32
  }
  func.func @transform_2(%arg0: i32) -> (i32, i32, i32) {
    %c0_i32 = arith.constant 0 : i32
    %c0_i32_0 = arith.constant 0 : i32
    %c0_i32_1 = arith.constant 0 : i32
    return %arg0, %c0_i32, %c0_i32_0 : i32, i32, i32
  }
  func.func @transform_3(%arg0: i32) -> (i32, i32, i32) {
    %c0_i32 = arith.constant 0 : i32
    %c0_i32_0 = arith.constant 0 : i32
    %c0_i32_1 = arith.constant 0 : i32
    return %arg0, %c0_i32, %c0_i32_0 : i32, i32, i32
  }
  func.func @transform_4(%arg0: i32) -> (i32, i32, i32) {
    %c0_i32 = arith.constant 0 : i32
    %c0_i32_0 = arith.constant 0 : i32
    %c0_i32_1 = arith.constant 0 : i32
    return %arg0, %c0_i32, %c0_i32_0 : i32, i32, i32
  }
}

</mosaic_0001>

<bundles_post_ra>
// kernel: tpu_custom_call.1
= control target key start
LH: loop header
LB: loop body
LE: loop exit
PB: predicated region body
PF: predicated region fallthrough
CT: control target
= control target key end

     0   :  { %9 = vsyncpa [#allocation4], 0  ;;  %s2003_s0 = inlined_call_operand.vmem [shape: f32[2,1,128], index: 0, kind: input, shape index: {}]   ;;  %s2004_s1 = inlined_call_operand.hbm [shape: f32[2,128,128], index: 1, kind: input, shape index: {}]   ;;  %s2005_s2 = inlined_call_operand.vmem [shape: f32[2,1,1], index: 2, kind: input, shape index: {}]   ;;  %s2006_s3 = inlined_call_operand.vmem [shape: f32[2,1,1], index: 3, kind: input, shape index: {}]   ;;  %s2007_s4 = inlined_call_operand.hbm [shape: f32[2,1,128], index: 4, kind: output, shape index: {}]  }
   0x1   :  { %11 = vsyncpa [#allocation4 + $0x1], 0 }
   0x2   :  { %12 = vsyncpa [#allocation5], 0 }
   0x3   :  { %14 = vsyncpa [#allocation5 + $0x1], 0  ;;  %s1582_s15 = smov 0   ;;  %s1584_s16 = smov 0  }
   0x4   :  { %s1586_s17 = smov 0   ;;  %s1588_s18 = smov 0  }
   0x5 LB: > { %s1603_s19 = sadd.s32 4294967295, %s1521_s18   ;;  %s1051_s20 = sadd.s32 4294967294, %s1521_s18   ;;  %s1521_s18 = sphi %s1588_s18, %s2023_s18   ;;  %s1517_s17 = sphi %s1586_s17, %s2022_s17   ;;  %s1513_s16 = sphi %s1584_s16, %s2021_s16   ;;  %s1509_s15 = sphi %s1582_s15, %s2020_s15  }
   0x6   : > { %s1607_s21 = sadd.s32 1, %s1521_s18   ;;  %s53_s22 = sadd.s32 1, %s1517_s17 }
   0x7   : > { %s50_s23 = ssub.s32 %s1521_s18, %s1607_s21  ;;  %p60_p0 = scmp.ne.s32.totalorder %s1517_s17, %s1513_s16 }
   0x8   : > { %p51_p1 = scmp.eq.s32.totalorder %s50_s23, 0  ;;  %p61_p2 = scmp.eq.s32.totalorder %s1521_s18, 0 }
   0x9   : > { %p66_p3 = scmp.ne.s32.totalorder %s1513_s16, %s1509_s15  ;;  %p67_p4 = scmp.eq.s32.totalorder %s1603_s19, 0 }
   0xa   : > { %s1619_s24 = scalar_select %p51_p1, %s1517_s17, %s53_s22  }
   0xb   : > { %p1621_p5 = por %p61_p2, %p60_p0  ;;  %p1625_p6 = por %p67_p4, %p66_p3 }
   0xc   : > { %p142_p7 = scmp.eq.s32.totalorder %s1603_s19, 1  ;;  %p148_p8 = scmp.eq.s32.totalorder %s1051_s20, 1 }
   0xd   : > { %p1306_p10 = scmp.lt.s32.totalorder %s1521_s18, 2  ;;  %s174_s29 = sand.u32 1, %s1517_s17  }
   0xe   : > { %p1632_p11 = por %p142_p7, %p60_p0  ;;  %p1636_p12 = por %p148_p8, %p66_p3 }
   0xf   : > { %s1079_s30 = sshll.u32 %s1521_s18, 11  ;;  %s1054_s5 = sshll.u32 %s174_s29, 7 }
  0x10   : > { %s2011_s27 = scalar_select %p1632_p11, 1, 0 }
  0x11   : > { %s2012_s28 = scalar_select %p1636_p12, 1, 0 }
  0x12   : > { %s1645_s8 = scalar_lea.hbm %s2004_s1, %s1079_s30  ;;  %s178_s9 = scalar_lea.vmem [#allocation3], %s1054_s5 }
  0x13   : > { %s185_s10 = sshll.u32 %s178_s9, 4  ;;  %p1649_p13 = pnand %p1306_p10, %p1621_p5  ;;  %s1653_s10 = int_to_ptr.vmem [resolvable:$true] %s185_s10 }
  0x14   : > { %s1655_s12 = scalar_lea.sflag [#allocation4], %s174_s29  ;;  %s1401_s13 = scalar_lea.hbm %s1645_s8, 2048 }
  0x15   : > { %p1402_p0 = scmp.ne.s32.totalorder %s1645_s8, %s1401_s13  ;;  %p1403_p1 = pneg %p1649_p13 }
  0x16   : > { %s1406_s22 = scalar_lea.hbm %s2004_s1, 4096  ;;  %p1407_p4 = scmp.lt.u32.totalorder %s1645_s8, %s2004_s1 }
  0x17   : > { %p1404_p2 = pnand %p1403_p1, %p1402_p0  ;;  %p1408_p5 = scmp.lt.u32.totalorder %s1406_s22, %s1401_s13 }
  0x18   : > { %p1410_p8 = scmp.lt.u32.totalorder %s1401_s13, %s1645_s8 }
  0x19   : > { %p1405_p3 = pneg %p1404_p2  ;;  %p1409_p7 = por %p1408_p5, %p1407_p4 }
  0x1b   : > { %p1411_p10 = por %p1410_p8, %p1409_p7 }
  0x1d   : > { %p1412_p9 = pnand %p1411_p10, %p1405_p3 }
  0x1f   : > { %1415 = shalt.err (!%p1412_p9)
}
  0x20   : > { %s1416_s29 = scalar_lea.vmem %s1653_s10, 2048  ;;  %s1547_s30 = smov [#allocation3]  }
  0x21   : > { %p1417_p0 = scmp.ne.s32.totalorder %s1653_s10, %s1416_s29  ;;  %s1421_s5 = sshll.u32 %s1547_s30, 4  ;;  %s1422_s5 = int_to_ptr.vmem [resolvable:$false] %s1421_s5 }
  0x22   : > { %s1423_s6 = scalar_lea.vmem %s1422_s5, 4096  ;;  %p1424_p11 = scmp.lt.s32.totalorder %s1653_s10, %s1422_s5 }
  0x23   : > { %p1419_p2 = pnand %p1417_p0, %p1403_p1  ;;  %p1425_p4 = scmp.lt.s32.totalorder %s1423_s6, %s1416_s29 }
  0x25   : > { %p1420_p12 = pneg %p1419_p2  ;;  %p1426_p5 = por %p1425_p4, %p1424_p11 }
  0x27   : > { %p1427_p7 = pnand %p1426_p5, %p1420_p12 }
  0x29   : > { %1430 = shalt.err (!%p1427_p7)
}
  0x2a   : > { %s1548_s7 = smov 128   ;;  %s1549_s9 = smov 8  }
  0x2b   : > { %1301 = dma.hbm_to_vmem [thread:$0]  (!%p1649_p13), %s1645_s8, 2048, %s1653_s10, %s1655_s12, %s1548_s7, %s1548_s7, %s1549_s9  }
  0x2c   : > { %p1057_p9 = scmp.ge.s32.totalorder %s1521_s18, 1  ;;  %p205_p1 = scmp.lt.s32.totalorder %s1521_s18, 3 }
  0x2e   : > { %p206_p3 = pnand %p1057_p9, %p205_p1 }
  0x2f   : > { %s1686_s13 = sand.u32 (!%p206_p3), 1, %s1513_s16  }
  0x30   : > { %209 = sbr.rel (%p206_p3) target bundleno = 2857 (0xb29), region = 36  ;;  %s1058_s14 = sshll.u32 (!%p206_p3), %s1686_s13, 7 }
  0x31   : > { %s212_s20 = scalar_lea.sflag (!%p206_p3), [#allocation4], %s1686_s13  ;;  %s1690_s22 = scalar_lea.vmem (!%p206_p3), [#allocation3], %s1058_s14 }
  0x37   : > { %1500 = dma.done.wait (%p1625_p6), %s212_s20, 2048  }
  0x38   : > { %1502 = vsyncadd (%p1625_p6), %s212_s20, 4294965248  ;;  %v278_v0 = vlaneseq  ;;  %v1550_v1 = vmov 0   ;;  %p248_p11 = scmp.lt.s32.totalorder %s1603_s19, 1  ;;  %v1551_v3 = vmov 0.0   ;;  %v1552_v5 = vmov -1e+30  }
  0x39   : > { %1396 = vset.pattern.permute.xlu0 %v1550_v1  ;;  %v258_v7 = vld [vmem:[%s1690_s22] sm:$0xff]  ;;  %v1714_v8 = vld [vmem:[%s1690_s22 + $0x8] sm:$0xff]  ;;  %v1717_v9 = vld [vmem:[%s1690_s22 + $0x10] sm:$0xff]  ;;  %s247_s6 = scalar_lea.vmem [#allocation6], %s1686_s13  ;;  %s1883_s7 = smov 0  }
  0x3a   : > { %v1697_v2 = vand.u32 127, %v278_v0  ;;  %s1701_s8 = scalar_select %p248_p11, %s1603_s19, 1  ;;  %v1220_v10 = vpack.c.bf16 %v1714_v8, %v258_v7  ;;  %v1721_v11 = vld [vmem:[%s1690_s22 + $0x18] sm:$0xff]  ;;  %1161 = vmatprep.mubr.f32.mxu0 %v258_v7  ;;  %v1733_v13 = vshrl.u32 %v278_v0, 7  ;;  %v266_v14 = vld [vmem:[%s1690_s22 + $0x40] sm:$0xff]  ;;  %v263_v18 = vld [vmem:[%s1690_s22 + $0x28] sm:$0xff] }
  0x3b   : > { %v1224_v12 = vpack.c.bf16 %v1721_v11, %v1717_v9  ;;  %v262_v17 = vld [vmem:[%s1690_s22 + $0x20] sm:$0xff]  ;;  %1173 = vmatprep.mubr.f32.mxu1 %v266_v14  ;;  %v264_v27 = vld [vmem:[%s1690_s22 + $0x30] sm:$0xff]  ;;  %v265_v28 = vld [vmem:[%s1690_s22 + $0x38] sm:$0xff] }
  0x3c   : > { %vm280_vm0 = vcmp.lt.s32.totalorder %v1697_v2, 8  ;;  %s250_s11 = scalar_lea.vmem %s2003_s0, %s1701_s8  ;;  %s253_s25 = scalar_lea.vmem %s2005_s2, %s1701_s8  ;;  %1221 = vmatprep.subr.bf16.mxu0 %v1220_v10  ;;  %1276 = vmatprep.subr.bf16.mxu1 %v1220_v10  ;;  %v495_v20 = vsub.s32 0, %v1733_v13  ;;  %v1228_v24 = vpack.c.bf16 %v263_v18, %v262_v17  ;;  %v1232_v30 = vpack.c.bf16 %v265_v28, %v264_v27  ;;  %v267_v31 = vld [vmem:[%s1690_s22 + $0x48] sm:$0xff]  ;;  %v268_v33 = vld [vmem:[%s1690_s22 + $0x50] sm:$0xff]  ;;  %v269_v34 = vld [vmem:[%s1690_s22 + $0x58] sm:$0xff] }
  0x3d   : > { %v1706_v4 = vsel %vm280_vm0, 0.125, %v1551_v3   ;;  %v1710_v6 = vsel %vm280_vm0, 0.0, %v1552_v5   ;;  %s256_s5 = scalar_lea.vmem %s2006_s3, %s1701_s8  ;;  %1223 = vmatpush3.bf16.xpose.msra.mxu0 %v1220_v10  ;;  %1284 = vmatpush3.bf16.xpose.msra.mxu1 %v1220_v10  ;;  %v274_v15 = vld [vmem:[%s253_s25] sm:$0x1]  ;;  %v1236_v32 = vpack.c.bf16 %v267_v31, %v266_v14  ;;  %v1240_v35 = vpack.c.bf16 %v269_v34, %v268_v33  ;;  %v271_v37 = vld [vmem:[%s1690_s22 + $0x68] sm:$0xff]  ;;  %v272_v39 = vld [vmem:[%s1690_s22 + $0x70] sm:$0xff] }
  0x3e   : > { %1225 = vmatprep.subr.bf16.mxu0 %v1224_v12  ;;  %1277 = vmatprep.subr.bf16.mxu1 %v1224_v12  ;;  %v1740_v16 = vld [vmem:[%s250_s11] sm:$0x1]  ;;  %v275_v19 = vmul.f32 %v274_v15, %v274_v15  ;;  %v273_v40 = vld [vmem:[%s1690_s22 + $0x78] sm:$0xff]  ;;  %v436_v42 = vadd.s32 72, %v1733_v13  ;;  %v435_v44 = vadd.s32 64, %v1733_v13  ;;  %v430_v45 = vadd.s32 24, %v1733_v13 }
  0x3f   : > { %v276_v21 = vld [vmem:[%s256_s5] sm:$0x1]  ;;  %v1248_v41 = vpack.c.bf16 %v273_v40, %v272_v39  ;;  %v438_v46 = vadd.s32 88, %v1733_v13  ;;  %v429_v47 = vadd.s32 16, %v1733_v13  ;;  %v437_v48 = vadd.s32 80, %v1733_v13 }
  0x40   : > { %v277_v22 = vand.u32 2147483647, %v276_v21  ;;  %v491_v23 = vmul.f32 2.0, %v275_v19  ;;  %v270_v36 = vld [vmem:[%s1690_s22 + $0x60] sm:$0xff]  ;;  %v428_v49 = vadd.s32 8, %v1733_v13  ;;  %vm452_vm1 = vcmp.eq.s32.totalorder %v436_v42, %v1697_v2 }
  0x41   : > { %v1244_v38 = vpack.c.bf16 %v271_v37, %v270_v36  ;;  %vm443_vm2 = vcmp.eq.s32.totalorder %v1733_v13, %v1697_v2  ;;  %v432_v50 = vadd.s32 40, %v1733_v13  ;;  %vm451_vm3 = vcmp.eq.s32.totalorder %v435_v44, %v1697_v2 }
  0x42   : > { %v496_v25 = vrot.slane %v491_v23, %v495_v20  ;;  %v517_v26 = vmul.f32 2.0, %v277_v22  ;;  %vm446_vm4 = vcmp.eq.s32.totalorder %v430_v45, %v1697_v2  ;;  %vm454_vm5 = vcmp.eq.s32.totalorder %v438_v46, %v1697_v2 }
  0x43   : > { %vm445_vm6 = vcmp.eq.s32.totalorder %v429_v47, %v1697_v2  ;;  %vm453_vm7 = vcmp.eq.s32.totalorder %v437_v48, %v1697_v2  ;;  %v1068_v52 = vsel %vm452_vm1, 1.0, %v1551_v3  ;;  %v1059_v53 = vsel %vm443_vm2, 1.0, %v1551_v3 }
  0x44   : > { %498 = vperm.xlu0 %1396, %v496_v25   ;;  %v522_v29 = vrot.slane %v517_v26, %v495_v20  ;;  %vm444_vm8 = vcmp.eq.s32.totalorder %v428_v49, %v1697_v2  ;;  %v1067_v54 = vsel %vm451_vm3, 1.0, %v1551_v3  ;;  %v1062_v55 = vsel %vm446_vm4, 1.0, %v1551_v3 }
  0x45   : > { %1227 = vmatpush3.bf16.xpose.msra.mxu0 %v1224_v12  ;;  %1285 = vmatpush3.bf16.xpose.msra.mxu1 %v1224_v12  ;;  %v1070_v56 = vsel %vm454_vm5, 1.0, %v1551_v3  ;;  %v1061_v57 = vsel %vm445_vm6, 1.0, %v1551_v3  ;;  %v1069_v58 = vsel %vm453_vm7, 1.0, %v1551_v3  ;;  %vm448_vm9 = vcmp.eq.s32.totalorder %v432_v50, %v1697_v2 }
  0x46   : > { %1229 = vmatprep.subr.bf16.mxu0 %v1228_v24  ;;  %1278 = vmatprep.subr.bf16.mxu1 %v1228_v24  ;;  %v440_v59 = vadd.s32 104, %v1733_v13  ;;  %v431_v60 = vadd.s32 32, %v1733_v13  ;;  %v1060_v62 = vsel %vm444_vm8, 1.0, %v1551_v3  ;;  %v439_v5 = vadd.s32 96, %v1733_v13 }
  0x47   : > { %v1064_v10 = vsel %vm448_vm9, 1.0, %v1551_v3  ;;  %v434_v15 = vadd.s32 56, %v1733_v13  ;;  %v442_v21 = vadd.s32 120, %v1733_v13  ;;  %v433_v22 = vadd.s32 48, %v1733_v13 }
  0x48   : > { %524 = vperm.xlu0 %1396, %v522_v29   ;;  %vm456_vm10 = vcmp.eq.s32.totalorder %v440_v59, %v1697_v2  ;;  %vm447_vm11 = vcmp.eq.s32.totalorder %v431_v60, %v1697_v2  ;;  %vm455_vm12 = vcmp.eq.s32.totalorder %v439_v5, %v1697_v2 }
  0x49   : > { %v1063_v29 = vsel %vm447_vm11, 1.0, %v1551_v3  ;;  %vm450_vm13 = vcmp.eq.s32.totalorder %v434_v15, %v1697_v2  ;;  %vm458_vm14 = vcmp.eq.s32.totalorder %v442_v21, %v1697_v2  ;;  %v1071_v42 = vsel %vm455_vm12, 1.0, %v1551_v3 }
  0x4a   : > { %v1066_v46 = vsel %vm450_vm13, 1.0, %v1551_v3  ;;  %vm449_vm15 = vcmp.eq.s32.totalorder %v433_v22, %v1697_v2 }
  0x4d   : > { %1231 = vmatpush3.bf16.xpose.msra.mxu0 %v1228_v24  ;;  %1286 = vmatpush3.bf16.xpose.msra.mxu1 %v1228_v24 }
  0x4e   : > { %1233 = vmatprep.subr.bf16.mxu0 %v1232_v30  ;;  %1279 = vmatprep.subr.bf16.mxu1 %v1232_v30 }
  0x55   : > { %1235 = vmatpush3.bf16.xpose.msra.mxu0 %v1232_v30  ;;  %1287 = vmatpush3.bf16.xpose.msra.mxu1 %v1232_v30 }
  0x56   : > { %1237 = vmatprep.subr.bf16.mxu0 %v1236_v32  ;;  %1280 = vmatprep.subr.bf16.mxu1 %v1236_v32 }
  0x5d   : > { %1239 = vmatpush3.bf16.xpose.msra.mxu0 %v1236_v32  ;;  %1288 = vmatpush3.bf16.xpose.msra.mxu1 %v1236_v32 }
  0x5e   : > { %1241 = vmatprep.subr.bf16.mxu0 %v1240_v35  ;;  %1281 = vmatprep.subr.bf16.mxu1 %v1240_v35 }
  0x65   : > { %1243 = vmatpush3.bf16.xpose.msra.mxu0 %v1240_v35  ;;  %1289 = vmatpush3.bf16.xpose.msra.mxu1 %v1240_v35 }
  0x66   : > { %1245 = vmatprep.subr.bf16.mxu0 %v1244_v38  ;;  %1282 = vmatprep.subr.bf16.mxu1 %v1244_v38 }
  0x6d   : > { %1247 = vmatpush3.bf16.xpose.msra.mxu0 %v1244_v38  ;;  %1290 = vmatpush3.bf16.xpose.msra.mxu1 %v1244_v38 }
  0x6e   : > { %1249 = vmatprep.subr.bf16.mxu0 %v1248_v41  ;;  %1283 = vmatprep.subr.bf16.mxu1 %v1248_v41 }
  0x75   : > { %1251 = vmatpush3.bf16.xpose.msra.mxu0 %v1248_v41  ;;  %1291 = vmatpush3.bf16.xpose.msra.mxu1 %v1248_v41 }
  0x7c   : > { %1162 = vmatmul.mubr.f32.vlgmr.msra.gmra.mrb[0].mxu0 %v1714_v8  ;;  %1174 = vmatmul.mubr.f32.vlgmr.msra.gmra.mrb[0].mxu1 %v267_v31 }
  0x7d   : > { %1164 = vmatprep.mubr.f32.mxu0 %v1717_v9  ;;  %1176 = vmatprep.mubr.f32.mxu1 %v268_v33 }
  0x80   : > { %1165 = vmatmul.mubr.f32.gmra.mrb[2].mxu0 %v1721_v11  ;;  %1177 = vmatmul.mubr.f32.gmra.mrb[2].mxu1 %v269_v34  ;;  %v441_v34 = vadd.s32 112, %v1733_v13 }
  0x81   : > { %1167 = vmatprep.mubr.f32.mxu0 %v262_v17  ;;  %1179 = vmatprep.mubr.f32.mxu1 %v270_v36 }
  0x82   : > { %vm457_vm1 = vcmp.eq.s32.totalorder %v441_v34, %v1697_v2 }
  0x83   : > { %v1073_v5 = vsel %vm457_vm1, 1.0, %v1551_v3 }
  0x84   : > { %1168 = vmatmul.mubr.f32.gmra.mrb[4].mxu0 %v263_v18  ;;  %1180 = vmatmul.mubr.f32.gmra.mrb[4].mxu1 %v271_v37 }
  0x85   : > { %1170 = vmatprep.mubr.f32.mxu0 %v264_v27  ;;  %1182 = vmatprep.mubr.f32.mxu1 %v272_v39 }
  0x88   : > { %1171 = vmatmul.mubr.f32.gmra.mrb[6].mxu0 %v265_v28  ;;  %1183 = vmatmul.mubr.f32.gmra.mrb[6].mxu1 %v273_v40  ;;  %v1072_v28 = vsel %vm456_vm10, 1.0, %v1551_v3 }
  0xc3   : > { %v1758_v43 = vpop.permute.xlu0 %498 }
  0xc7   : > { %v1775_v51 = vpop.permute.xlu0 %524 }
  0xc8   : > { %v536_v61 = vmul.f32 %v1068_v52, %v1775_v51  ;;  %v527_v63 = vmul.f32 %v1059_v53, %v1775_v51  ;;  %v535_v0 = vmul.f32 %v1067_v54, %v1775_v51  ;;  %v530_v1 = vmul.f32 %v1062_v55, %v1775_v51 }
  0xc9   : > { %v538_v7 = vmul.f32 %v1070_v56, %v1775_v51  ;;  %v529_v8 = vmul.f32 %v1061_v57, %v1775_v51  ;;  %v537_v9 = vmul.f32 %v1069_v58, %v1775_v51  ;;  %v528_v14 = vmul.f32 %v1060_v62, %v1775_v51 }
  0xca   : > { %v532_v25 = vmul.f32 %v1064_v10, %v1775_v51  ;;  %v540_v13 = vmul.f32 %v1072_v28, %v1775_v51  ;;  %v1074_v52 = vsel %vm458_vm14, 1.0, %v1551_v3  ;;  %v531_v60 = vmul.f32 %v1063_v29, %v1775_v51 }
  0xcb   : > { %v539_v62 = vmul.f32 %v1071_v42, %v1775_v51  ;;  %v534_v10 = vmul.f32 %v1066_v46, %v1775_v51 }
 0x14f   : > { %v1163_v11 = vpop.f32.mrb[0].mxu0  ;;  %v1175_v12 = vpop.f32.mrb[0].mxu1 }
 0x150   : > { %v502_v17 = vmul.f32 %v1163_v11, %v1758_v43  ;;  %v510_v18 = vmul.f32 %v1175_v12, %v1758_v43  ;;  %v347_v19 = vpop.f32.mrb[1].mxu0  ;;  %v387_v20 = vpop.f32.mrb[1].mxu1  ;;  %v542_v12 = vmul.f32 %v1074_v52, %v1775_v51 }
 0x151   : > { %v501_v23 = vmul.f32 %v1758_v43, %v347_v19  ;;  %v509_v24 = vmul.f32 %v1758_v43, %v387_v20 }
 0x152   : > { %v552_v26 = vadd.f32 %v536_v61, %v510_v18  ;;  %v544_v27 = vadd.f32 %v528_v14, %v502_v17 }
 0x153   : > { %v1812_v30 = vadd.f32 %v527_v63, %v501_v23  ;;  %v1814_v31 = vadd.f32 %v535_v0, %v509_v24  ;;  %v1166_v32 = vpop.f32.mrb[2].mxu0  ;;  %v1178_v33 = vpop.f32.mrb[2].mxu1  ;;  %v541_v23 = vmul.f32 %v1073_v5, %v1775_v51 }
 0x154   : > { %640 = vst [vmem:[#allocation2 + $0x48] sm:$0xff] %v552_v26  ;;  %v504_v35 = vmul.f32 %v1166_v32, %v1758_v43  ;;  %v512_v36 = vmul.f32 %v1178_v33, %v1758_v43  ;;  %v357_v37 = vpop.f32.mrb[3].mxu0  ;;  %v397_v38 = vpop.f32.mrb[3].mxu1  ;;  %v560_v39 = vand.u32 2147483647, %v544_v27  ;;  %632 = vst [vmem:[#allocation2 + $0x8] sm:$0xff] %v544_v27 }
 0x155   : > { %631 = vst [vmem:[#allocation2] sm:$0xff] %v1812_v30  ;;  %639 = vst [vmem:[#allocation2 + $0x40] sm:$0xff] %v1814_v31  ;;  %v503_v40 = vmul.f32 %v1758_v43, %v357_v37  ;;  %v511_v41 = vmul.f32 %v1758_v43, %v397_v38  ;;  %v568_v58 = vand.u32 2147483647, %v552_v26  ;;  %v559_v19 = vand.u32 2147483647, %v1812_v30 }
 0x156   : > { %v1829_v44 = vadd.f32 %v530_v1, %v504_v35  ;;  %v554_v45 = vadd.f32 %v538_v7, %v512_v36  ;;  %577 = vadd.xlane.f32.xlu1 %v560_v39  ;;  %v1065_v1 = vsel %vm449_vm15, 1.0, %v1551_v3  ;;  %v567_v28 = vand.u32 2147483647, %v1814_v31 }
 0x157   : > { %v545_v47 = vadd.f32 %v529_v8, %v503_v40  ;;  %v1835_v48 = vadd.f32 %v537_v9, %v511_v41  ;;  %v1169_v49 = vpop.f32.mrb[4].mxu0  ;;  %v1181_v50 = vpop.f32.mrb[4].mxu1  ;;  %v533_v21 = vmul.f32 %v1065_v1, %v1775_v51 }
 0x158   : > { %634 = vst [vmem:[#allocation2 + $0x18] sm:$0xff] %v1829_v44  ;;  %642 = vst [vmem:[#allocation2 + $0x58] sm:$0xff] %v554_v45  ;;  %v506_v53 = vmul.f32 %v1169_v49, %v1758_v43  ;;  %v514_v54 = vmul.f32 %v1181_v50, %v1758_v43  ;;  %v367_v55 = vpop.f32.mrb[5].mxu0  ;;  %v407_v56 = vpop.f32.mrb[5].mxu1  ;;  %v570_v57 = vand.u32 2147483647, %v554_v45 }
 0x159   : > { %633 = vst [vmem:[#allocation2 + $0x10] sm:$0xff] %v545_v47  ;;  %641 = vst [vmem:[#allocation2 + $0x50] sm:$0xff] %v1835_v48  ;;  %v505_v59 = vmul.f32 %v1758_v43, %v367_v55  ;;  %v513_v61 = vmul.f32 %v1758_v43, %v407_v56  ;;  %v561_v20 = vand.u32 2147483647, %v545_v47  ;;  %v562_v30 = vand.u32 2147483647, %v1829_v44 }
 0x15a   : > { %v548_v63 = vadd.f32 %v532_v25, %v506_v53  ;;  %v556_v0 = vadd.f32 %v540_v13, %v514_v54  ;;  %597 = vadd.xlane.f32.xlu0 %v570_v57  ;;  %593 = vadd.xlane.f32.xlu1 %v568_v58  ;;  %v569_v51 = vand.u32 2147483647, %v1835_v48 }
 0x15b   : > { %v547_v7 = vadd.f32 %v531_v60, %v505_v59  ;;  %v555_v8 = vadd.f32 %v539_v62, %v513_v61  ;;  %v1172_v9 = vpop.f32.mrb[6].mxu0  ;;  %v1184_v11 = vpop.f32.mrb[6].mxu1 }
 0x15c   : > { %636 = vst [vmem:[#allocation2 + $0x28] sm:$0xff] %v548_v63  ;;  %644 = vst [vmem:[#allocation2 + $0x68] sm:$0xff] %v556_v0  ;;  %v508_v14 = vmul.f32 %v1172_v9, %v1758_v43  ;;  %v516_v15 = vmul.f32 %v1184_v11, %v1758_v43  ;;  %v377_v17 = vpop.f32.mrb[7].mxu0  ;;  %v417_v18 = vpop.f32.mrb[7].mxu1  ;;  %v572_v29 = vand.u32 2147483647, %v556_v0 }
 0x15d   : > { %635 = vst [vmem:[#allocation2 + $0x20] sm:$0xff] %v547_v7  ;;  %643 = vst [vmem:[#allocation2 + $0x60] sm:$0xff] %v555_v8  ;;  %v507_v3 = vmul.f32 %v1758_v43, %v377_v17  ;;  %v515_v22 = vmul.f32 %v1758_v43, %v417_v18  ;;  %v564_v32 = vand.u32 2147483647, %v548_v63  ;;  %v563_v33 = vand.u32 2147483647, %v547_v7 }
 0x15e   : > { %v550_v24 = vadd.f32 %v534_v10, %v508_v14  ;;  %v558_v25 = vadd.f32 %v542_v12, %v516_v15  ;;  %575 = vadd.xlane.f32.xlu1 %v559_v19  ;;  %579 = vadd.xlane.f32.xlu0 %v561_v20  ;;  %v571_v34 = vand.u32 2147483647, %v555_v8  ;;  %v1870_v19 = vmov 1e+30  }
 0x15f   : > { %v549_v26 = vadd.f32 %v533_v21, %v507_v3  ;;  %v557_v27 = vadd.f32 %v541_v23, %v515_v22  ;;  %v1872_v20 = vmov 0.0   ;;  %v2014_v3 = vmov %v1706_v4 }
 0x160   : > { %638 = vst [vmem:[#allocation2 + $0x38] sm:$0xff] %v550_v24  ;;  %646 = vst [vmem:[#allocation2 + $0x78] sm:$0xff] %v558_v25  ;;  %v574_v43 = vand.u32 2147483647, %v558_v25  ;;  %v566_v31 = vand.u32 2147483647, %v550_v24 }
 0x161   : > { %637 = vst [vmem:[#allocation2 + $0x30] sm:$0xff] %v549_v26  ;;  %645 = vst [vmem:[#allocation2 + $0x70] sm:$0xff] %v557_v27  ;;  %v565_v35 = vand.u32 2147483647, %v549_v26  ;;  %v573_v36 = vand.u32 2147483647, %v557_v27 }
 0x162   : > { %591 = vadd.xlane.f32.xlu1 %v567_v28  ;;  %601 = vadd.xlane.f32.xlu0 %v572_v29 }
 0x166   : > { %581 = vadd.xlane.f32.xlu1 %v562_v30  ;;  %605 = vadd.xlane.f32.xlu0 %v574_v43 }
 0x16a   : > { %595 = vadd.xlane.f32.xlu1 %v569_v51 }
 0x16e   : > { %585 = vadd.xlane.f32.xlu1 %v564_v32 }
 0x172   : > { %583 = vadd.xlane.f32.xlu1 %v563_v33 }
 0x176   : > { %599 = vadd.xlane.f32.xlu1 %v571_v34 }
 0x17a   : > { %589 = vadd.xlane.f32.xlu1 %v566_v31 }
 0x17e   : > { %587 = vadd.xlane.f32.xlu1 %v565_v35 }
 0x182   : > { %603 = vadd.xlane.f32.xlu1 %v573_v36 }
 0x1e3   : > { %v578_v37 = vpop.xlane.xlu1 %577 }
 0x1e7   : > { %v594_v38 = vpop.xlane.xlu1 %593  ;;  %v598_v44 = vpop.xlane.xlu0 %597 }
 0x1eb   : > { %v576_v39 = vpop.xlane.xlu1 %575  ;;  %v580_v46 = vpop.xlane.xlu0 %579 }
 0x1ef   : > { %v592_v40 = vpop.xlane.xlu1 %591  ;;  %v602_v53 = vpop.xlane.xlu0 %601 }
 0x1f3   : > { %v582_v41 = vpop.xlane.xlu1 %581  ;;  %v606_v61 = vpop.xlane.xlu0 %605 }
 0x1f7   : > { %v596_v13 = vpop.xlane.xlu1 %595 }
 0x1fb   : > { %v586_v42 = vpop.xlane.xlu1 %585 }
 0x1fc   : > { %v608_v50 = vmax.f32 %v578_v37, %v586_v42 }
 0x1fe   : > { %v612_v56 = vmax.f32 %v608_v50, %v594_v38 }
 0x1ff   : > { %v584_v45 = vpop.xlane.xlu1 %583 }
 0x200   : > { %v607_v48 = vmax.f32 %v576_v39, %v584_v45  ;;  %v616_v63 = vmax.f32 %v612_v56, %v602_v53 }
 0x202   : > { %v611_v54 = vmax.f32 %v607_v48, %v592_v40 }
 0x203   : > { %v600_v47 = vpop.xlane.xlu1 %599 }
 0x204   : > { %v615_v59 = vmax.f32 %v611_v54, %v600_v47 }
 0x206   : > { %v619_v5 = vmax.f32 %v615_v59, %v616_v63 }
 0x207   : > { %v590_v49 = vpop.xlane.xlu1 %589 }
 0x208   : > { %v610_v52 = vmax.f32 %v582_v41, %v590_v49 }
 0x20a   : > { %v614_v57 = vmax.f32 %v610_v52, %v598_v44 }
 0x20b   : > { %v588_v55 = vpop.xlane.xlu1 %587 }
 0x20c   : > { %v609_v58 = vmax.f32 %v580_v46, %v588_v55  ;;  %v618_v0 = vmax.f32 %v614_v57, %v606_v61 }
 0x20e   : > { %v613_v60 = vmax.f32 %v609_v58, %v596_v13 }
 0x20f   : > { %v604_v62 = vpop.xlane.xlu1 %603 }
 0x210   : > { %v617_v1 = vmax.f32 %v613_v60, %v604_v62 }
 0x212   : > { %v620_v7 = vmax.f32 %v617_v1, %v618_v0 }
 0x214   : > { %v621_v8 = vmax.f32 %v619_v5, %v620_v7 }
 0x216   : > { %v622_v9 = vrot.slane %v621_v8, 4 }
 0x218   : > { %v623_v10 = vmax.f32 %v621_v8, %v622_v9 }
 0x21a   : > { %v624_v11 = vrot.slane %v623_v10, 2 }
 0x21c   : > { %v625_v12 = vmax.f32 %v623_v10, %v624_v11 }
 0x21e   : > { %v626_v14 = vrot.slane %v625_v12, 1 }
 0x220   : > { %v627_v15 = vmax.f32 %v625_v12, %v626_v14 }
 0x222   : > { %v628_v17 = vadd.f32 1e-06, %v627_v15 }
 0x224   : > { %1397 = vrcp.f32 %v628_v17 }
 0x22e   : > { %v1867_v18 = vpop.eup %1397 }
 0x22f LB: >> { %v660_v21 = vld [vmem:[#allocation2] sm:$0xff]  ;;  %v661_v22 = vld [vmem:[#allocation2 + $0x8] sm:$0xff]  ;;  %v662_v23 = vld [vmem:[#allocation2 + $0x10] sm:$0xff]  ;;  %v1553_v24 = vmov 0.0|0.0   ;;  %vm1554_vm2 = vmmov 0   ;;  %v1555_v27 = vmov 0.0   ;;  %s914_s9 = scvt.s32.f32 %s1545_s7  ;;  %s1545_s7 = sphi %s1883_s7, %s654_s7   ;;  %v1541_v4 = vphi %v1706_v4, %v2016_v4   ;;  %v1537_v3 = vphi %v2014_v3, %v923_v3   ;;  %v1533_v6 = vphi %v1710_v6, %v2015_v6   ;;  %v1529_v20 = vphi %v1872_v20, %v907_v20   ;;  %v1525_v19 = vphi %v1870_v19, %v913_v19  }
 0x230   : >> { %1252 = vmatprep.subr.bf16.mxu0 %v1553_v24  ;;  %v1253_v25 = vpack.c.bf16 %v661_v22, %v660_v21  ;;  %v663_v26 = vld [vmem:[#allocation2 + $0x18] sm:$0xff]  ;;  %1217 = vmatprep.mubr.msk.f32.mxu0 %vm1554_vm2, %v1555_v27  ;;  %v664_v29 = vld [vmem:[#allocation2 + $0x20] sm:$0xff]  ;;  %v665_v30 = vld [vmem:[#allocation2 + $0x28] sm:$0xff]  ;;  %vm752_vm3 = vcmask 1040384   ;;  %v764_v58 = vand.u32 2147483647, %v1529_v20 }
 0x231   : >> { %v1256_v28 = vpack.c.bf16 %v663_v26, %v662_v23  ;;  %v1259_v43 = vpack.c.bf16 %v665_v30, %v664_v29  ;;  %v666_v51 = vld [vmem:[#allocation2 + $0x30] sm:$0xff]  ;;  %v667_v32 = vld [vmem:[#allocation2 + $0x38] sm:$0xff]  ;;  %v668_v34 = vld [vmem:[#allocation2 + $0x40] sm:$0xff]  ;;  %s915_s14 = sadd.f32 3.0, %s914_s9  ;;  %s654_s7 = sadd.s32 1, %s1545_s7  }
 0x232   : >> { %1254 = vmatpush3.bf16.msra.mxu0 %v1253_v25  ;;  %v1262_v33 = vpack.c.bf16 %v667_v32, %v666_v51  ;;  %v669_v31 = vld [vmem:[#allocation2 + $0x48] sm:$0xff]  ;;  %v670_v36 = vld [vmem:[#allocation2 + $0x50] sm:$0xff]  ;;  %v671_v37 = vld [vmem:[#allocation2 + $0x58] sm:$0xff]  ;;  %v765_v59 = vmul.f32 1e-06, %v764_v58  ;;  %p651_p6 = scmp.ge.s32.totalorder %s654_s7, 500  }
 0x233   : >> { %1255 = vmatprep.subr.bf16.mxu0 %v1553_v24  ;;  %v1265_v35 = vpack.c.bf16 %v669_v31, %v668_v34  ;;  %v1268_v38 = vpack.c.bf16 %v671_v37, %v670_v36  ;;  %v672_v39 = vld [vmem:[#allocation2 + $0x60] sm:$0xff]  ;;  %v673_v40 = vld [vmem:[#allocation2 + $0x68] sm:$0xff]  ;;  %v674_v13 = vld [vmem:[#allocation2 + $0x70] sm:$0xff]  ;;  %s1076_s8 = sshll.u32 (%p651_p6), %s1603_s19, 4  ;;  %s938_s12 = sshll.u32 (%p651_p6), %s247_s6, 4  ;;  %s939_s12 = int_to_ptr.vmem [resolvable:$true] %s938_s12 }
 0x234   : >> { %v1271_v41 = vpack.c.bf16 %v673_v40, %v672_v39  ;;  %v675_v42 = vld [vmem:[#allocation2 + $0x78] sm:$0xff]  ;;  %v766_v60 = vadd.f32 1e-06, %v765_v59  ;;  %s1963_s11 = scalar_lea.hbm (%p651_p6), %s2007_s4, %s1076_s8  ;;  %s926_s23 = scalar_lea.sflag (%p651_p6), [#allocation5], %s1686_s13 }
 0x235   : >> { %v1274_v44 = vpack.c.bf16 %v675_v42, %v674_v13  ;;  %s1431_s25 = scalar_lea.vmem (%p651_p6), %s939_s12, 16  ;;  %p2017_p13 = scmp.ne.s32.totalorder (%p651_p6), %s2011_s27, 0 }
 0x236   : >> { %1257 = vmatpush3.bf16.msra.mxu0 %v1256_v28  ;;  %p1432_p12 = scmp.ne.s32.totalorder (%p651_p6), %s939_s12, %s1431_s25  ;;  %s1556_s29 = smov (%p651_p6), [#allocation6]  }
 0x237   : >> { %1258 = vmatprep.subr.bf16.mxu0 %v1553_v24  ;;  %s1435_s30 = sshll.u32 (%p651_p6), %s1556_s29, 4  ;;  %s1436_s30 = int_to_ptr.vmem [resolvable:$false] %s1435_s30 }
 0x238   : > { %p1433_p8 = pnand (%p651_p6), %p1432_p12, %p2017_p13  ;;  %s1437_s5 = scalar_lea.vmem (%p651_p6), %s1436_s30, 32 }
 0x239   : > { %p1438_p0 = scmp.lt.s32.totalorder (%p651_p6), %s939_s12, %s1436_s30  ;;  %p1439_p2 = scmp.lt.s32.totalorder (%p651_p6), %s1437_s5, %s1431_s25 }
 0x23a   : >> { %1260 = vmatpush3.bf16.msra.mxu0 %v1259_v43  ;;  %p1434_p10 = pneg (%p651_p6), %p1433_p8 }
 0x23b   : >> { %1261 = vmatprep.subr.bf16.mxu0 %v1553_v24  ;;  %p1440_p4 = por (%p651_p6), %p1439_p2, %p1438_p0 }
 0x23d   : > { %p1441_p5 = pnand (%p651_p6), %p1440_p4, %p1434_p10 }
 0x23e   : >> { %1263 = vmatpush3.bf16.msra.mxu0 %v1262_v33 }
 0x23f   : >> { %1264 = vmatprep.subr.bf16.mxu0 %v1553_v24 }
 0x242   : >> { %1266 = vmatpush3.bf16.msra.mxu0 %v1265_v35 }
 0x243   : >> { %1267 = vmatprep.subr.bf16.mxu0 %v1553_v24 }
 0x246   : >> { %1269 = vmatpush3.bf16.msra.mxu0 %v1268_v38 }
 0x247   : >> { %1270 = vmatprep.subr.bf16.mxu0 %v1553_v24 }
 0x24a   : >> { %1272 = vmatpush3.bf16.msra.mxu0 %v1271_v41 }
 0x24b   : >> { %1273 = vmatprep.subr.bf16.mxu0 %v1553_v24 }
 0x24e   : >> { %1275 = vmatpush3.bf16.msra.mxu0 %v1274_v44 }
 0x251   : >> { %1218 = vmatmul.mubr.f32.vlgmr.msra.gmra.mrb[0].mxu0 %v1537_v3 }
 0x324   : >> { %v742_v45 = vpop.f32.mrb[0].mxu0 }
 0x325   : >> { %v746_v46 = vsub.f32 %v742_v45, %v1740_v16  ;;  %v1219_v47 = vpop.f32.mrb[1].mxu0 }
 0x327   : >> { %v747_v48 = vmul.f32 %v1867_v18, %v746_v46 }
 0x329   : >> { %v748_v49 = vsub.f32 %v1537_v3, %v747_v48 }
 0x32b   : >> { %v1903_v50 = vsel %vm280_vm0, %v748_v49, -1e+30   ;;  %v756_v56 = vsel %vm280_vm0, %v748_v49, 1e+30 }
 0x32c   : >> { %v760_v52 = vsel %vm752_vm3, %v1903_v50, -inf  ;;  %v750_v53 = vsub.f32 %v1903_v50, %v1533_v6  ;;  %v757_v57 = vsel %vm752_vm3, %v756_v56, inf }
 0x32d   : >> { %761 = vmax.xlane.f32.xlu1 %v760_v52 }
 0x32e   : >> { %v751_v54 = vand.u32 2147483647, %v750_v53 }
 0x330   : >> { %v753_v55 = vsel %vm752_vm3, %v751_v54, -inf }
 0x331   : >> { %754 = vmax.xlane.f32.xlu0 %v753_v55 }
 0x335   : >> { %758 = vmin.xlane.f32.xlu0 %v757_v57 }
 0x3ba   : >> { %v762_v7 = vpop.xlane.xlu1 %761 }
 0x3be   : >> { %v755_v61 = vpop.xlane.xlu0 %754 }
 0x3bf   : >> { %v763_v62 = vadd.f32 %v1525_v19, %v755_v61 }
 0x3c1   : >> { %v767_v63 = vadd.f32 %v766_v60, %v763_v62 }
 0x3c2   : >> { %v759_v6 = vpop.xlane.xlu0 %758 }
 0x3c3   : >> { %v771_v0 = vadd.f32 %v1529_v20, %v767_v63  ;;  %v768_v1 = vsub.f32 %v1529_v20, %v767_v63  ;;  %v1075_v5 = vadd.f32 -1.0, %v759_v6 }
 0x3c5   : >> { %v772_v8 = vmin.f32 %v771_v0, %v762_v7  ;;  %v770_v9 = vmax.f32 %v768_v1, %v1075_v5 }
 0x3c7   : >> { %v773_v10 = vmax.f32 %v772_v8, %v770_v9 }
 0x3c9   : >> { %v774_v11 = vadd.f32 %v773_v10, %v770_v9 }
 0x3cb   : >> { %v775_v12 = vmul.f32 0.5, %v774_v11 }
 0x3cd   : >> { %v776_v14 = vsub.f32 %v1903_v50, %v775_v12 }
 0x3cf   : >> { %v777_v15 = vmax.f32 %v776_v14, 0.0 }
 0x3d1   : >> { %v778_v17 = vmin.f32 %v777_v15, 1.0 }
 0x3d3   : >> { %v779_v3 = vsel %vm752_vm3, %v778_v17, 0.0 }
 0x3d4   : >> { %780 = vadd.xlane.f32.xlu1 %v779_v3 }
 0x461   : >> { %v781_v19 = vpop.xlane.xlu1 %780 }
 0x462   : >> { %vm782_vm4 = vcmp.gt.f32.partialorder %v781_v19, 1.0 }
 0x463   : >> { %v783_v21 = vsel %vm782_vm4, %v775_v12, %v770_v9  ;;  %v784_v22 = vsel %vm782_vm4, %v773_v10, %v775_v12 }
 0x464   : >> { %v785_v23 = vadd.f32 %v784_v22, %v783_v21 }
 0x466   : >> { %v786_v20 = vmul.f32 0.5, %v785_v23 }
 0x468   : >> { %v787_v24 = vsub.f32 %v1903_v50, %v786_v20 }
 0x46a   : >> { %v788_v25 = vmax.f32 %v787_v24, 0.0 }
 0x46c   : >> { %v789_v26 = vmin.f32 %v788_v25, 1.0 }
 0x46e   : >> { %v790_v27 = vsel %vm752_vm3, %v789_v26, 0.0 }
 0x46f   : >> { %791 = vadd.xlane.f32.xlu0 %v790_v27 }
 0x4fc   : >> { %v792_v28 = vpop.xlane.xlu0 %791 }
 0x4fd   : >> { %vm793_vm5 = vcmp.gt.f32.partialorder %v792_v28, 1.0 }
 0x4fe   : >> { %v794_v29 = vsel %vm793_vm5, %v786_v20, %v783_v21  ;;  %v795_v30 = vsel %vm793_vm5, %v784_v22, %v786_v20 }
 0x4ff   : >> { %v796_v43 = vadd.f32 %v795_v30, %v794_v29 }
 0x501   : >> { %v797_v51 = vmul.f32 0.5, %v796_v43 }
 0x503   : >> { %v798_v32 = vsub.f32 %v1903_v50, %v797_v51 }
 0x505   : >> { %v799_v33 = vmax.f32 %v798_v32, 0.0 }
 0x507   : >> { %v800_v34 = vmin.f32 %v799_v33, 1.0 }
 0x509   : >> { %v801_v31 = vsel %vm752_vm3, %v800_v34, 0.0 }
 0x50a   : >> { %802 = vadd.xlane.f32.xlu1 %v801_v31 }
 0x597   : >> { %v803_v35 = vpop.xlane.xlu1 %802 }
 0x598   : >> { %vm804_vm6 = vcmp.gt.f32.partialorder %v803_v35, 1.0 }
 0x599   : >> { %v805_v36 = vsel %vm804_vm6, %v797_v51, %v794_v29  ;;  %v806_v37 = vsel %vm804_vm6, %v795_v30, %v797_v51 }
 0x59a   : >> { %v807_v38 = vadd.f32 %v806_v37, %v805_v36 }
 0x59c   : >> { %v808_v39 = vmul.f32 0.5, %v807_v38 }
 0x59e   : >> { %v809_v40 = vsub.f32 %v1903_v50, %v808_v39 }
 0x5a0   : >> { %v810_v41 = vmax.f32 %v809_v40, 0.0 }
 0x5a2   : >> { %v811_v13 = vmin.f32 %v810_v41, 1.0 }
 0x5a4   : >> { %v812_v42 = vsel %vm752_vm3, %v811_v13, 0.0 }
 0x5a5   : >> { %813 = vadd.xlane.f32.xlu0 %v812_v42 }
 0x632   : >> { %v814_v44 = vpop.xlane.xlu0 %813 }
 0x633   : >> { %vm815_vm7 = vcmp.gt.f32.partialorder %v814_v44, 1.0 }
 0x634   : >> { %v816_v45 = vsel %vm815_vm7, %v808_v39, %v805_v36  ;;  %v817_v46 = vsel %vm815_vm7, %v806_v37, %v808_v39 }
 0x635   : >> { %v818_v47 = vadd.f32 %v817_v46, %v816_v45 }
 0x637   : >> { %v819_v48 = vmul.f32 0.5, %v818_v47 }
 0x639   : >> { %v820_v49 = vsub.f32 %v1903_v50, %v819_v48 }
 0x63b   : >> { %v821_v52 = vmax.f32 %v820_v49, 0.0 }
 0x63d   : >> { %v822_v53 = vmin.f32 %v821_v52, 1.0 }
 0x63f   : >> { %v823_v54 = vsel %vm752_vm3, %v822_v53, 0.0 }
 0x640   : >> { %824 = vadd.xlane.f32.xlu1 %v823_v54 }
 0x6cd   : >> { %v825_v55 = vpop.xlane.xlu1 %824 }
 0x6ce   : >> { %vm826_vm8 = vcmp.gt.f32.partialorder %v825_v55, 1.0 }
 0x6cf   : >> { %v827_v56 = vsel %vm826_vm8, %v819_v48, %v816_v45  ;;  %v828_v57 = vsel %vm826_vm8, %v817_v46, %v819_v48  ;;  %v916_v48 = vstv %s915_s14 }
 0x6d0   : >> { %v829_v58 = vadd.f32 %v828_v57, %v827_v56  ;;  %1399 = vrcp.f32 %v916_v48 }
 0x6d2   : >> { %v830_v59 = vmul.f32 0.5, %v829_v58 }
 0x6d4   : >> { %v831_v60 = vsub.f32 %v1903_v50, %v830_v59 }
 0x6d6   : >> { %v832_v61 = vmax.f32 %v831_v60, 0.0 }
 0x6d8   : >> { %v833_v62 = vmin.f32 %v832_v61, 1.0 }
 0x6da   : >> { %v834_v63 = vsel %vm752_vm3, %v833_v62, 0.0  ;;  %v1400_v49 = vpop.eup %1399 }
 0x6db   : >> { %835 = vadd.xlane.f32.xlu0 %v834_v63  ;;  %1292 = vpush %v1400_v49 }
 0x70c   : >> { %s1293_s20 = spop %1292 }
 0x70d   : >> { %s919_s22 = smul.f32 %s1293_s20, %s914_s9 }
 0x768   : >> { %v836_v6 = vpop.xlane.xlu0 %835 }
 0x769   : >> { %vm837_vm9 = vcmp.gt.f32.partialorder %v836_v6, 1.0 }
 0x76a   : >> { %v838_v0 = vsel %vm837_vm9, %v830_v59, %v827_v56  ;;  %v839_v1 = vsel %vm837_vm9, %v828_v57, %v830_v59 }
 0x76b   : >> { %v840_v5 = vadd.f32 %v839_v1, %v838_v0 }
 0x76d   : >> { %v841_v7 = vmul.f32 0.5, %v840_v5 }
 0x76f   : >> { %v842_v8 = vsub.f32 %v1903_v50, %v841_v7 }
 0x771   : >> { %v843_v9 = vmax.f32 %v842_v8, 0.0 }
 0x773   : >> { %v844_v10 = vmin.f32 %v843_v9, 1.0  ;;  %v921_v9 = vstv %s919_s22 }
 0x775   : >> { %v845_v11 = vsel %vm752_vm3, %v844_v10, 0.0 }
 0x776   : >> { %846 = vadd.xlane.f32.xlu1 %v845_v11 }
 0x803   : >> { %v847_v12 = vpop.xlane.xlu1 %846 }
 0x804   : >> { %vm848_vm10 = vcmp.gt.f32.partialorder %v847_v12, 1.0 }
 0x805   : >> { %v849_v14 = vsel %vm848_vm10, %v841_v7, %v838_v0  ;;  %v850_v15 = vsel %vm848_vm10, %v839_v1, %v841_v7 }
 0x806   : >> { %v851_v17 = vadd.f32 %v850_v15, %v849_v14 }
 0x808   : >> { %v852_v3 = vmul.f32 0.5, %v851_v17 }
 0x80a   : >> { %v853_v19 = vsub.f32 %v1903_v50, %v852_v3 }
 0x80c   : >> { %v854_v21 = vmax.f32 %v853_v19, 0.0 }
 0x80e   : >> { %v855_v22 = vmin.f32 %v854_v21, 1.0 }
 0x810   : >> { %v856_v23 = vsel %vm752_vm3, %v855_v22, 0.0 }
 0x811   : >> { %857 = vadd.xlane.f32.xlu0 %v856_v23 }
 0x89e   : >> { %v858_v20 = vpop.xlane.xlu0 %857 }
 0x89f   : >> { %vm859_vm11 = vcmp.gt.f32.partialorder %v858_v20, 1.0 }
 0x8a0   : >> { %v860_v24 = vsel %vm859_vm11, %v852_v3, %v849_v14  ;;  %v861_v25 = vsel %vm859_vm11, %v850_v15, %v852_v3 }
 0x8a1   : >> { %v862_v26 = vadd.f32 %v861_v25, %v860_v24 }
 0x8a3   : >> { %v863_v27 = vmul.f32 0.5, %v862_v26 }
 0x8a5   : >> { %v864_v28 = vsub.f32 %v1903_v50, %v863_v27 }
 0x8a7   : >> { %v865_v29 = vmax.f32 %v864_v28, 0.0 }
 0x8a9   : >> { %v866_v30 = vmin.f32 %v865_v29, 1.0 }
 0x8ab   : >> { %v867_v43 = vsel %vm752_vm3, %v866_v30, 0.0 }
 0x8ac   : >> { %868 = vadd.xlane.f32.xlu1 %v867_v43 }
 0x939   : >> { %v869_v51 = vpop.xlane.xlu1 %868 }
 0x93a   : >> { %vm870_vm12 = vcmp.gt.f32.partialorder %v869_v51, 1.0 }
 0x93b   : >> { %v871_v32 = vsel %vm870_vm12, %v863_v27, %v860_v24  ;;  %v872_v33 = vsel %vm870_vm12, %v861_v25, %v863_v27 }
 0x93c   : >> { %v873_v34 = vadd.f32 %v872_v33, %v871_v32 }
 0x93e   : >> { %v874_v31 = vmul.f32 0.5, %v873_v34 }
 0x940   : >> { %v875_v35 = vsub.f32 %v1903_v50, %v874_v31 }
 0x942   : >> { %v876_v36 = vmax.f32 %v875_v35, 0.0 }
 0x944   : >> { %v877_v37 = vmin.f32 %v876_v36, 1.0 }
 0x946   : >> { %v878_v38 = vsel %vm752_vm3, %v877_v37, 0.0 }
 0x947   : >> { %879 = vadd.xlane.f32.xlu0 %v878_v38 }
 0x9d4   : >> { %v880_v39 = vpop.xlane.xlu0 %879 }
 0x9d5   : >> { %vm881_vm13 = vcmp.gt.f32.partialorder %v880_v39, 1.0 }
 0x9d6   : >> { %v882_v40 = vsel %vm881_vm13, %v874_v31, %v871_v32  ;;  %v883_v41 = vsel %vm881_vm13, %v872_v33, %v874_v31 }
 0x9d7   : >> { %v884_v13 = vadd.f32 %v883_v41, %v882_v40 }
 0x9d9   : >> { %v885_v42 = vmul.f32 0.5, %v884_v13 }
 0x9db   : >> { %v886_v44 = vsub.f32 %v1903_v50, %v885_v42 }
 0x9dd   : >> { %v887_v45 = vmax.f32 %v886_v44, 0.0 }
 0x9df   : >> { %v888_v46 = vmin.f32 %v887_v45, 1.0 }
 0x9e1   : >> { %v889_v47 = vsel %vm752_vm3, %v888_v46, 0.0 }
 0x9e2   : >> { %890 = vadd.xlane.f32.xlu1 %v889_v47 }
 0xa6f   : >> { %v891_v52 = vpop.xlane.xlu1 %890 }
 0xa70   : >> { %vm892_vm14 = vcmp.gt.f32.partialorder %v891_v52, 1.0 }
 0xa71   : >> { %v893_v53 = vsel %vm892_vm14, %v885_v42, %v882_v40  ;;  %v894_v54 = vsel %vm892_vm14, %v883_v41, %v885_v42 }
 0xa72   : >> { %v895_v55 = vadd.f32 %v894_v54, %v893_v53 }
 0xa74   : >> { %v896_v56 = vmul.f32 0.5, %v895_v55 }
 0xa76   : >> { %v897_v57 = vsub.f32 %v1903_v50, %v896_v56 }
 0xa78   : >> { %v898_v58 = vmax.f32 %v897_v57, 0.0 }
 0xa7a   : >> { %v899_v59 = vmin.f32 %v898_v58, 1.0 }
 0xa7c   : >> { %v900_v60 = vsel %vm752_vm3, %v899_v59, 0.0 }
 0xa7d   : >> { %901 = vadd.xlane.f32.xlu0 %v900_v60 }
 0xb0a   : >> { %v902_v61 = vpop.xlane.xlu0 %901 }
 0xb0b   : >> { %vm903_vm15 = vcmp.gt.f32.partialorder %v902_v61, 1.0 }
 0xb0c   : >> { %v904_v62 = vsel %vm903_vm15, %v896_v56, %v893_v53  ;;  %v905_v63 = vsel %vm903_vm15, %v894_v54, %v896_v56 }
 0xb0d   : >> { %v906_v6 = vadd.f32 %v905_v63, %v904_v62  ;;  %v911_v0 = vsub.f32 %v905_v63, %v904_v62 }
 0xb0f   : >> { %v907_v20 = vmul.f32 0.5, %v906_v6   ;;  %v912_v1 = vmul.f32 0.5, %v911_v0  ;;  %v2015_v6 = vmov %v1903_v50 }
 0xb11   : >> { %v908_v5 = vsub.f32 %v1903_v50, %v907_v20  ;;  %v913_v19 = vadd.f32 1e-07, %v912_v1  }
 0xb13   : >> { %v909_v7 = vmax.f32 %v908_v5, 0.0 }
 0xb15   : >> { %v910_v8 = vmin.f32 %v909_v7, 1.0   ;;  %653 = sbr.rel (!%p651_p6) target bundleno = 559 (0x22f), region = 97 }
 0xb17   : >> { %v920_v10 = vsub.f32 %v910_v8, %v1541_v4  ;;  %v2016_v4 = vmov %v910_v8  ;;  %924 = vst [vmem:[%s247_s6] sm:$0x1] (%p651_p6), %v910_v8 }
 0xb19   : >> { %v922_v11 = vmul.f32 %v921_v9, %v920_v10 }
 0xb1b   : >> { %v923_v3 = vadd.f32 %v922_v11, %v910_v8  }
 0xb1c   : > { %1444 = shalt.err (!%p1441_p5)
}
 0xb1d   : > { %s1445_s19 = scalar_lea.hbm %s1963_s11, 16  ;;  %s1449_s7 = scalar_lea.hbm %s2007_s4, 32 }
 0xb1e   : > { %p1446_p7 = scmp.ne.s32.totalorder %s1963_s11, %s1445_s19  ;;  %p1450_p3 = scmp.lt.u32.totalorder %s1963_s11, %s2007_s4 }
 0xb1f   : > { %p1451_p11 = scmp.lt.u32.totalorder %s1449_s7, %s1445_s19  ;;  %p1453_p12 = scmp.lt.u32.totalorder %s1445_s19, %s1963_s11 }
 0xb20   : > { %p1447_p9 = pnand %p1446_p7, %p2017_p13 }
 0xb21   : > { %p1452_p6 = por %p1451_p11, %p1450_p3 }
 0xb22   : > { %p1448_p1 = pneg %p1447_p9 }
 0xb23   : > { %p1454_p8 = por %p1453_p12, %p1452_p6 }
 0xb25   : > { %p1455_p10 = pnand %p1454_p8, %p1448_p1 }
 0xb27   : > { %1458 = shalt.err (!%p1455_p10)
}
 0xb28   : > { %1296 = dma.vmem_to_hbm [thread:$0]  (%p2017_p13), %s939_s12, 16, %s1963_s11, %s926_s23  }
 0xb29 PF: > { %s950_s20 = sand.u32 1, %s1509_s15   ;;  %p2018_p0 = scmp.ne.s32.totalorder %s2012_s28, 0 }
 0xb2a   : > { %p2019_p2 = scmp.ge.s32.totalorder %s1521_s18, 2  ;;  %s951_s22 = scalar_lea.sflag [#allocation5], %s950_s20 }
 0xb2c   : > { %p1303_p4 = pnand %p2019_p2, %p2018_p0 }
 0xb2e   : > { %1504 = dma.done.wait (!%p1303_p4), %s951_s22, 16  }
 0xb2f   : > { %1506 = vsyncadd (!%p1303_p4), %s951_s22, 4294967280  ;;  %p17_p5 = scmp.ge.s32.totalorder %s1607_s21, 4   ;;  %s2020_s15 = smov %s1513_s16 }
 0xb30   : > { %s2021_s16 = smov %s1517_s17  ;;  %s2022_s17 = smov %s1619_s24 }
 0xb31   : > { %s2023_s18 = smov %s1607_s21  ;;  %19 = sbr.rel (!%p17_p5) target bundleno = 5 (0x5), region = 108 }
 0xb38   :  { %955 = vsyncpa [#allocation4], 1 }
 0xb39   :  { %957 = vsyncpa [#allocation4 + $0x1], 1 }
 0xb3a   :  { %958 = vsyncpa [#allocation5], 1 }
 0xb3b   :  { %960 = vsyncpa [#allocation5 + $0x1], 1 }

</bundles_post_ra>
